<compile_context>
chip_gen: v7x
topology: tpu7x:2x2x1
jax: 0.10.0
libtpu: 0.0.40
codegen_flags: <defaults>
</compile_context>

<pallas_src>
import functools

import jax
import jax.numpy as jnp
from jax.experimental import pallas as pl
from jax.experimental.pallas import tpu as pltpu


# ----------------------------------------------------------------------------
# Pass A: per-metapath sums of tanh(z @ W1 + b1) over the node tile.
# ----------------------------------------------------------------------------
def score_sum_kernel(z_ref, w1_ref, b1_ref, hsum_ref, *, n_valid, need_mask):
    # z_ref:    (tn, M, D)   tile of the original (N, M, D) input
    # w1_ref:   (D, Hp)      first Linear weight (transposed, zero-padded to Hp)
    # b1_ref:   (1, Hp)      first Linear bias   (zero-padded)
    # hsum_ref: (1, M, Hp)   per-tile, per-metapath sum of tanh(...)
    tn, M, _ = z_ref.shape

    if need_mask:
        # Mask rows past N (only matters for a ragged last tile).
        row = pl.program_id(0) * tn + jax.lax.broadcasted_iota(jnp.int32, (tn, 1), 0)
        valid = row < n_valid                                    # (tn, 1)

    w1 = w1_ref[...]
    b1 = b1_ref[...]

    partial = []
    for m in range(M):                                           # M is small, unrolled
        zm = z_ref[:, m, :]                                      # (tn, D)
        hm = jnp.tanh(jnp.dot(zm, w1, preferred_element_type=jnp.float32) + b1)
        if need_mask:
            hm = jnp.where(valid, hm, 0.0)                       # zero padded rows
        partial.append(jnp.sum(hm, axis=0, keepdims=True))       # (1, Hp)
    hsum_ref[0] = jnp.concatenate(partial, axis=0)               # (M, Hp)


# ----------------------------------------------------------------------------
# Pass B: beta-weighted sum over metapaths.
# ----------------------------------------------------------------------------
def weighted_sum_kernel(beta_ref, z_ref, out_ref):
    # beta_ref: (M,)         softmax weights, SMEM (scalar reads)
    # z_ref:    (tn, M, D)   tile of z
    # out_ref:  (tn, D)
    M = z_ref.shape[1]
    acc = z_ref[:, 0, :] * beta_ref[0]                           # scalar * (tn, D)
    for m in range(1, M):
        acc = acc + z_ref[:, m, :] * beta_ref[m]
    out_ref[...] = acc.astype(out_ref.dtype)


# ----------------------------------------------------------------------------
# Wrapper
# ----------------------------------------------------------------------------
def semantic_attention(z, w1, b1, w2, *, block_n=None):
    """z: (N, M, D) float32, w1: (D, H), b1: (1, H), w2: (H, 1). Returns (N, D)."""
    N, M, D = z.shape
    H = w1.shape[1]
    Hp = ((H + 127) // 128) * 128                        # lane-dense hidden axis

    f32 = jnp.float32
    w1_p = jnp.zeros((D, Hp), f32).at[:, :H].set(w1.astype(f32))
    b1_p = jnp.zeros((1, Hp), f32).at[:, :H].set(b1.astype(f32).reshape(1, H))
    w2_p = jnp.zeros((Hp, 1), f32).at[:H, :].set(w2.astype(f32))

    # Node-tile size: keep a double-buffered (block_n, M, D) tile well inside
    # scoped VMEM on v5e/v6e/v7x, accounting for the (8,128) padding of the
    # two minor dims; multiple of 8 so the (tn, D) output block is
    # sublane-aligned when the grid has more than one tile.
    if block_n is None:
        mp = max(8, ((M + 7) // 8) * 8)
        dp = max(128, ((D + 127) // 128) * 128)
        budget = 4 * 1024 * 1024                          # per z-tile buffer
        block_n = max(8, min(1024, budget // (mp * dp * 4)))
    block_n = min(block_n, N)
    if block_n < N:
        block_n = max(8, (block_n // 8) * 8)
    T = pl.cdiv(N, block_n)
    need_mask = (N % block_n) != 0

    bytes_z = N * M * D * 4
    cost_a = pl.CostEstimate(flops=2 * N * M * D * Hp,
                             transcendentals=N * M * Hp,
                             bytes_accessed=bytes_z + D * Hp * 4 + T * M * Hp * 4)
    cost_b = pl.CostEstimate(flops=2 * N * M * D,
                             transcendentals=0,
                             bytes_accessed=bytes_z + N * D * 4)

    # ---- pass A: per-tile, per-metapath sums of tanh(z W1 + b1) --------------
    hsum = pl.pallas_call(
        functools.partial(score_sum_kernel, n_valid=N, need_mask=need_mask),
        out_shape=jax.ShapeDtypeStruct((T, M, Hp), f32),
        grid=(T,),
        in_specs=[
            pl.BlockSpec((block_n, M, D), lambda i: (i, 0, 0)),
            pl.BlockSpec((D, Hp), lambda i: (0, 0)),
            pl.BlockSpec((1, Hp), lambda i: (0, 0)),
        ],
        out_specs=pl.BlockSpec((1, M, Hp), lambda i: (i, 0, 0)),
        compiler_params=pltpu.CompilerParams(dimension_semantics=("parallel",)),
        cost_estimate=cost_a,
    )(z, w1_p, b1_p)

    # ---- tiny per-metapath softmax in plain JAX ------------------------------
    w = (jnp.sum(hsum, axis=0) / N) @ w2_p               # (M, 1): fold W2 after mean
    beta = jax.nn.softmax(w, axis=0)[:, 0]               # (M,)

    # ---- pass B: out = sum_m beta[m] * z[:, m, :] ----------------------------
    out = pl.pallas_call(
        weighted_sum_kernel,
        out_shape=jax.ShapeDtypeStruct((N, D), z.dtype),
        grid=(T,),
        in_specs=[
            pl.BlockSpec(memory_space=pltpu.MemorySpace.SMEM),   # beta scalars
            pl.BlockSpec((block_n, M, D), lambda i: (i, 0, 0)),
        ],
        out_specs=pl.BlockSpec((block_n, D), lambda i: (i, 0)),
        compiler_params=pltpu.CompilerParams(dimension_semantics=("parallel",)),
        cost_estimate=cost_b,
    )(beta.astype(f32), z)

    return out


def reference(z, w1, b1, w2):
    """Plain-JAX mirror of the PyTorch forward."""
    h = jnp.tanh(z @ w1 + b1)             # (N, M, H)
    s = h @ w2                            # (N, M, 1)
    w = s.mean(0)                         # (M, 1)
    beta = jax.nn.softmax(w, axis=0)      # (M, 1)
    return (beta[None, :, :] * z).sum(1)  # (N, D)


if __name__ == "__main__":
    # N nodes, M metapaths, in_size D, hidden H (module default hidden_size=128).
    # N chosen not to divide the explicit block_n so the ragged-tile mask path
    # is exercised too.
    N, M, D, H = 200, 4, 64, 128
    key = jax.random.PRNGKey(0)
    kz, k1, kb, k2 = jax.random.split(key, 4)

    z = jax.random.normal(kz, (N, M, D), jnp.float32)
    # deterministic synthetic params: nn.Linear(D,H) with bias, nn.Linear(H,1) no bias
    w1 = jax.random.normal(k1, (D, H), jnp.float32) * (1.0 / jnp.sqrt(D))
    b1 = jax.random.normal(kb, (1, H), jnp.float32) * 0.1
    w2 = jax.random.normal(k2, (H, 1), jnp.float32) * (1.0 / jnp.sqrt(H))
    # TODO(synk): hidden_size=None branch (single bias-free Linear) not exercised;
    # same two-pass structure applies with the tanh / first matmul removed.

    out = jax.block_until_ready(semantic_attention(z, w1, b1, w2, block_n=64))
    ref = reference(z, w1, b1, w2)

    if not bool(jnp.allclose(out, ref, rtol=1e-4, atol=1e-4)):
        raise SystemExit("mismatch: max abs diff = %g"
                         % float(jnp.max(jnp.abs(out - ref))))
    print("KERNEL_OK")
</pallas_src>

<mosaic_0001>
module attributes {stable_mosaic.version = 11 : i64} {
  func.func @score_sum_kernel(%arg0: i32, %arg1: memref<64x4x64xf32, #tpu.memory_space<vmem>>, %arg2: memref<64x128xf32, #tpu.memory_space<vmem>>, %arg3: memref<1x128xf32, #tpu.memory_space<vmem>>, %arg4: memref<1x4x128xf32, #tpu.memory_space<vmem>>) attributes {dimension_semantics = [#tpu.dimension_semantics<parallel>], iteration_bounds = array<i64: 4>, scalar_prefetch = 0 : i64, scratch_operands = 0 : i64, tpu.core_type = #tpu.core_type<tc>, window_params = [{transform_indices = @transform_0, window_bounds = array<i64: 64, 4, 64>}, {pipeline_mode = #tpu.pipeline_mode<synchronous>, transform_indices = @transform_1, window_bounds = array<i64: 64, 128>}, {pipeline_mode = #tpu.pipeline_mode<synchronous>, transform_indices = @transform_2, window_bounds = array<i64: 1, 128>}, {transform_indices = @transform_3, window_bounds = array<i64: 1, 4, 128>}]} {
    %c64_i32 = arith.constant 64 : i32
    %0 = arith.muli %arg0, %c64_i32 : i32
    %1 = tpu.iota {dimensions = array<i32: 0>} : vector<64x1xi32>
    %2 = vector.broadcast %0 : i32 to vector<64x1xi32>
    %3 = arith.addi %2, %1 : vector<64x1xi32>
    %c200_i32 = arith.constant 200 : i32
    %4 = vector.broadcast %c200_i32 : i32 to vector<64x1xi32>
    %5 = arith.cmpi slt, %3, %4 : vector<64x1xi32>
    %c0 = arith.constant 0 : index
    %c0_0 = arith.constant 0 : index
    %6 = vector.load %arg2[%c0, %c0_0] : memref<64x128xf32, #tpu.memory_space<vmem>>, vector<64x128xf32>
    %c0_1 = arith.constant 0 : index
    %c0_2 = arith.constant 0 : index
    %7 = vector.load %arg3[%c0_1, %c0_2] : memref<1x128xf32, #tpu.memory_space<vmem>>, vector<1x128xf32>
    %c0_3 = arith.constant 0 : index
    %c0_4 = arith.constant 0 : index
    %c0_5 = arith.constant 0 : index
    %8 = vector.load %arg1[%c0_3, %c0_4, %c0_5] : memref<64x4x64xf32, #tpu.memory_space<vmem>>, vector<64x1x64xf32>
    %9 = vector.shape_cast %8 : vector<64x1x64xf32> to vector<64x64xf32>
    %cst = arith.constant dense<0.000000e+00> : vector<64x128xf32>
    %10 = tpu.matmul %9, %6, %cst {dimension_numbers = #tpu.dot_dimension_numbers<[1], [0], [0], [1], [0, 0, 1, 1], [], []>} : vector<64x64xf32>, vector<64x128xf32>, vector<64x128xf32> -> vector<64x128xf32>
    %11 = vector.broadcast %7 : vector<1x128xf32> to vector<64x128xf32>
    %12 = arith.addf %10, %11 : vector<64x128xf32>
    %13 = math.tanh %12 : vector<64x128xf32>
    %cst_6 = arith.constant 0.000000e+00 : f32
    %14 = vector.shape_cast %5 : vector<64x1xi1> to vector<64x1xi1>
    %15 = vector.broadcast %14 : vector<64x1xi1> to vector<64x128xi1>
    %16 = vector.broadcast %cst_6 : f32 to vector<64x128xf32>
    %17 = arith.select %15, %13, %16 : vector<64x128xi1>, vector<64x128xf32>
    %cst_7 = arith.constant dense<0.000000e+00> : vector<128xf32>
    %18 = vector.multi_reduction <add>, %17, %cst_7 [0] : vector<64x128xf32> to vector<128xf32>
    %19 = vector.shape_cast %18 : vector<128xf32> to vector<1x128xf32>
    %c0_8 = arith.constant 0 : index
    %c1 = arith.constant 1 : index
    %c0_9 = arith.constant 0 : index
    %20 = vector.load %arg1[%c0_8, %c1, %c0_9] : memref<64x4x64xf32, #tpu.memory_space<vmem>>, vector<64x1x64xf32>
    %21 = vector.shape_cast %20 : vector<64x1x64xf32> to vector<64x64xf32>
    %cst_10 = arith.constant dense<0.000000e+00> : vector<64x128xf32>
    %22 = tpu.matmul %21, %6, %cst_10 {dimension_numbers = #tpu.dot_dimension_numbers<[1], [0], [0], [1], [0, 0, 1, 1], [], []>} : vector<64x64xf32>, vector<64x128xf32>, vector<64x128xf32> -> vector<64x128xf32>
    %23 = vector.broadcast %7 : vector<1x128xf32> to vector<64x128xf32>
    %24 = arith.addf %22, %23 : vector<64x128xf32>
    %25 = math.tanh %24 : vector<64x128xf32>
    %cst_11 = arith.constant 0.000000e+00 : f32
    %26 = vector.shape_cast %5 : vector<64x1xi1> to vector<64x1xi1>
    %27 = vector.broadcast %26 : vector<64x1xi1> to vector<64x128xi1>
    %28 = vector.broadcast %cst_11 : f32 to vector<64x128xf32>
    %29 = arith.select %27, %25, %28 : vector<64x128xi1>, vector<64x128xf32>
    %cst_12 = arith.constant dense<0.000000e+00> : vector<128xf32>
    %30 = vector.multi_reduction <add>, %29, %cst_12 [0] : vector<64x128xf32> to vector<128xf32>
    %31 = vector.shape_cast %30 : vector<128xf32> to vector<1x128xf32>
    %c0_13 = arith.constant 0 : index
    %c2 = arith.constant 2 : index
    %c0_14 = arith.constant 0 : index
    %32 = vector.load %arg1[%c0_13, %c2, %c0_14] : memref<64x4x64xf32, #tpu.memory_space<vmem>>, vector<64x1x64xf32>
    %33 = vector.shape_cast %32 : vector<64x1x64xf32> to vector<64x64xf32>
    %cst_15 = arith.constant dense<0.000000e+00> : vector<64x128xf32>
    %34 = tpu.matmul %33, %6, %cst_15 {dimension_numbers = #tpu.dot_dimension_numbers<[1], [0], [0], [1], [0, 0, 1, 1], [], []>} : vector<64x64xf32>, vector<64x128xf32>, vector<64x128xf32> -> vector<64x128xf32>
    %35 = vector.broadcast %7 : vector<1x128xf32> to vector<64x128xf32>
    %36 = arith.addf %34, %35 : vector<64x128xf32>
    %37 = math.tanh %36 : vector<64x128xf32>
    %cst_16 = arith.constant 0.000000e+00 : f32
    %38 = vector.shape_cast %5 : vector<64x1xi1> to vector<64x1xi1>
    %39 = vector.broadcast %38 : vector<64x1xi1> to vector<64x128xi1>
    %40 = vector.broadcast %cst_16 : f32 to vector<64x128xf32>
    %41 = arith.select %39, %37, %40 : vector<64x128xi1>, vector<64x128xf32>
    %cst_17 = arith.constant dense<0.000000e+00> : vector<128xf32>
    %42 = vector.multi_reduction <add>, %41, %cst_17 [0] : vector<64x128xf32> to vector<128xf32>
    %43 = vector.shape_cast %42 : vector<128xf32> to vector<1x128xf32>
    %c0_18 = arith.constant 0 : index
    %c3 = arith.constant 3 : index
    %c0_19 = arith.constant 0 : index
    %44 = vector.load %arg1[%c0_18, %c3, %c0_19] : memref<64x4x64xf32, #tpu.memory_space<vmem>>, vector<64x1x64xf32>
    %45 = vector.shape_cast %44 : vector<64x1x64xf32> to vector<64x64xf32>
    %cst_20 = arith.constant dense<0.000000e+00> : vector<64x128xf32>
    %46 = tpu.matmul %45, %6, %cst_20 {dimension_numbers = #tpu.dot_dimension_numbers<[1], [0], [0], [1], [0, 0, 1, 1], [], []>} : vector<64x64xf32>, vector<64x128xf32>, vector<64x128xf32> -> vector<64x128xf32>
    %47 = vector.broadcast %7 : vector<1x128xf32> to vector<64x128xf32>
    %48 = arith.addf %46, %47 : vector<64x128xf32>
    %49 = math.tanh %48 : vector<64x128xf32>
    %cst_21 = arith.constant 0.000000e+00 : f32
    %50 = vector.shape_cast %5 : vector<64x1xi1> to vector<64x1xi1>
    %51 = vector.broadcast %50 : vector<64x1xi1> to vector<64x128xi1>
    %52 = vector.broadcast %cst_21 : f32 to vector<64x128xf32>
    %53 = arith.select %51, %49, %52 : vector<64x128xi1>, vector<64x128xf32>
    %cst_22 = arith.constant dense<0.000000e+00> : vector<128xf32>
    %54 = vector.multi_reduction <add>, %53, %cst_22 [0] : vector<64x128xf32> to vector<128xf32>
    %55 = vector.shape_cast %54 : vector<128xf32> to vector<1x128xf32>
    %56 = tpu.concatenate %19, %31, %43, %55 in 0 : vector<1x128xf32>, vector<1x128xf32>, vector<1x128xf32>, vector<1x128xf32> -> vector<4x128xf32>
    %c0_23 = arith.constant 0 : index
    %c0_24 = arith.constant 0 : index
    %c0_25 = arith.constant 0 : index
    %57 = vector.load %arg4[%c0_23, %c0_24, %c0_25] : memref<1x4x128xf32, #tpu.memory_space<vmem>>, vector<1x4x128xf32>
    %58 = vector.shape_cast %57 : vector<1x4x128xf32> to vector<4x128xf32>
    %59 = vector.shape_cast %56 : vector<4x128xf32> to vector<1x4x128xf32>
    tpu.vector_store %arg4[%c0_23, %c0_24, %c0_25], %59 {strides = array<i32>} : memref<1x4x128xf32, #tpu.memory_space<vmem>>, vector<1x4x128xf32>,
    return
  }
  func.func @transform_0(%arg0: i32) -> (i32, i32, i32) {
    %c0_i32 = arith.constant 0 : i32
    %c0_i32_0 = arith.constant 0 : i32
    %c0_i32_1 = arith.constant 0 : i32
    return %arg0, %c0_i32, %c0_i32_0 : i32, i32, i32
  }
  func.func @transform_1(%arg0: i32) -> (i32, i32) {
    %c0_i32 = arith.constant 0 : i32
    %c0_i32_0 = arith.constant 0 : i32
    %c0_i32_1 = arith.constant 0 : i32
    return %c0_i32, %c0_i32_0 : i32, i32
  }
  func.func @transform_2(%arg0: i32) -> (i32, i32) {
    %c0_i32 = arith.constant 0 : i32
    %c0_i32_0 = arith.constant 0 : i32
    %c0_i32_1 = arith.constant 0 : i32
    return %c0_i32, %c0_i32_0 : i32, i32
  }
  func.func @transform_3(%arg0: i32) -> (i32, i32, i32) {
    %c0_i32 = arith.constant 0 : i32
    %c0_i32_0 = arith.constant 0 : i32
    %c0_i32_1 = arith.constant 0 : i32
    return %arg0, %c0_i32, %c0_i32_0 : i32, i32, i32
  }
}

</mosaic_0001>

<bundles_post_ra>
// kernel: tpu_custom_call.1
= control target key start
LH: loop header
LB: loop body
LE: loop exit
PB: predicated region body
PF: predicated region fallthrough
CT: control target
= control target key end

     0   :  { %8 = vsyncpa [#allocation3], 0  ;;  %s3196_s0 = inlined_call_operand.vmem [shape: f32[200,4,64], index: 0, kind: input, shape index: {}]   ;;  %s3197_s1 = inlined_call_operand.vmem [shape: f32[64,128], index: 1, kind: input, shape index: {}]   ;;  %s3198_s2 = inlined_call_operand.vmem [shape: f32[1,128], index: 2, kind: input, shape index: {}]   ;;  %s3199_s3 = inlined_call_operand.hbm [shape: f32[4,4,128], index: 3, kind: output, shape index: {}]  }
   0x1   :  { %10 = vsyncpa [#allocation3 + $0x1], 0  ;;  %s2370_s12 = smov 0   ;;  %s2372_s13 = smov 0  }
   0x2   :  { %s2374_s14 = smov 0   ;;  %s2376_s15 = smov 0  }
   0x3 LB: > { %s1896_s16 = sadd.s32 4294967295, %s2347_s15   ;;  %s1897_s17 = sadd.s32 4294967294, %s2347_s15   ;;  %s2347_s15 = sphi %s2376_s15, %s3205_s15   ;;  %s2343_s14 = sphi %s2374_s14, %s3204_s14   ;;  %s2339_s13 = sphi %s2372_s13, %s3203_s13   ;;  %s2335_s12 = sphi %s2370_s12, %s3202_s12  }
   0x4   : > { %s2393_s18 = sadd.s32 1, %s2347_s15   ;;  %s91_s19 = sadd.s32 1, %s2343_s14 }
   0x5   : > { %s88_s20 = ssub.s32 %s2347_s15, %s2393_s18  ;;  %p101_p0 = scmp.ne.s32.totalorder %s2343_s14, %s2339_s13 }
   0x6   : > { %p89_p1 = scmp.eq.s32.totalorder %s88_s20, 0  ;;  %p102_p2 = scmp.eq.s32.totalorder %s1896_s16, 3 }
   0x7   : > { %p107_p3 = scmp.ne.s32.totalorder %s2339_s13, %s2335_s12  ;;  %p108_p4 = scmp.eq.s32.totalorder %s1897_s17, 3 }
   0x8   : > { %s2403_s21 = scalar_select %p89_p1, %s2343_s14, %s91_s19  }
   0x9   : > { %p2405_p5 = por %p102_p2, %p101_p0  ;;  %p2409_p6 = por %p108_p4, %p107_p3 }
   0xa   : > { %p1900_p7 = scmp.ge.s32.totalorder %s2347_s15, 1  ;;  %p149_p8 = scmp.lt.s32.totalorder %s2347_s15, 5 }
   0xc   : > { %p150_p9 = pnand %p1900_p7, %p149_p8 }
   0xd   : > { %v218_v0 = vld [vmem:[%s3197_s1] sm:$0xff] (!%p150_p9)  ;;  %v219_v1 = vld [vmem:[%s3197_s1 + $0x8] sm:$0xff] (!%p150_p9)  ;;  %v220_v2 = vld [vmem:[%s3197_s1 + $0x10] sm:$0xff] (!%p150_p9)  ;;  %s2424_s30 = sshll.u32 (!%p150_p9), %s1896_s16, 6  ;;  %vm362_vm0 = vcmask (!%p150_p9), 1041409   ;;  %vm365_vm1 = vcmask (!%p150_p9), 1042434  }
   0xe   : > { %153 = sbr.rel (%p150_p9) target bundleno = 418 (0x1a2), region = 32  ;;  %v2426_v3 = vpack.c.bf16 (!%p150_p9), %v219_v1, %v218_v0  ;;  %v221_v4 = vld [vmem:[%s3197_s1 + $0x18] sm:$0xff] (!%p150_p9)  ;;  %p182_p10 = scmp.lt.s32.totalorder (!%p150_p9), %s2424_s30, 199  ;;  %v222_v6 = vld [vmem:[%s3197_s1 + $0x20] sm:$0xff] (!%p150_p9)  ;;  %v223_v7 = vld [vmem:[%s3197_s1 + $0x28] sm:$0xff] (!%p150_p9)  ;;  %vm368_vm2 = vcmask (!%p150_p9), 1043459  }
   0xf   : > { %v2432_v5 = vpack.c.bf16 (!%p150_p9), %v221_v4, %v220_v2  ;;  %v2447_v8 = vpack.c.bf16 (!%p150_p9), %v223_v7, %v222_v6  ;;  %v224_v9 = vld [vmem:[%s3197_s1 + $0x30] sm:$0xff] (!%p150_p9)  ;;  %v225_v10 = vld [vmem:[%s3197_s1 + $0x38] sm:$0xff] (!%p150_p9)  ;;  %vm371_vm3 = vcmask (!%p150_p9), 1044484   ;;  %vm374_vm4 = vcmask (!%p150_p9), 1045509   ;;  %s174_s29 = sand.u32 (!%p150_p9), 1, %s2339_s13   ;;  %s3154_s9 = scalar_lea.hbm (!%p150_p9), %s3199_s3, %s2424_s30 }
  0x10   : > { %2119 = vmatprep.subr.bf16.mxu0 (!%p150_p9), %v2426_v3  ;;  %2135 = vmatprep.subr.bf16.mxu1 (!%p150_p9), %v2426_v3  ;;  %vm377_vm5 = vcmask (!%p150_p9), 1046534   ;;  %vm380_vm6 = vcmask (!%p150_p9), 1047559   ;;  %v2470_v17 = vpack.c.bf16 (!%p150_p9), %v225_v10, %v224_v9  ;;  %vm480_vm7 = vcmask (!%p150_p9), 523264   ;;  %s1901_s4 = sshll.u32 (!%p150_p9), %s174_s29, 2  ;;  %s2349_s16 = smov (!%p150_p9), [#allocation2]  }
  0x11   : > { %2121 = vmatpush3.bf16.msra.mxu0 (!%p150_p9), %v2426_v3  ;;  %2137 = vmatpush3.bf16.msra.mxu1 (!%p150_p9), %v2426_v3  ;;  %s176_s5 = scalar_lea.vmem (!%p150_p9), [#allocation2], %s1901_s4  ;;  %s2289_s17 = sshll.u32 (!%p150_p9), %s2349_s16, 4  ;;  %s2290_s17 = int_to_ptr.vmem [resolvable:$false] %s2289_s17 }
  0x12   : > { %2123 = vmatprep.subr.bf16.mxu0 (!%p150_p9), %v2432_v5  ;;  %2139 = vmatprep.subr.bf16.mxu1 (!%p150_p9), %v2432_v5  ;;  %s1838_s6 = sshll.u32 (!%p150_p9), %s176_s5, 4  ;;  %s2291_s19 = scalar_lea.vmem (!%p150_p9), %s2290_s17, 128  ;;  %s3156_s6 = int_to_ptr.vmem [resolvable:$true] %s1838_s6 }
  0x13   : > { %p2292_p0 = scmp.lt.s32.totalorder (!%p150_p9), %s3156_s6, %s2290_s17 }
  0x15   : > { %s183_s10 = scalar_select %p182_p10, %s2424_s30, 199  ;;  %2125 = vmatpush3.bf16.msra.mxu0 %v2432_v5  ;;  %2141 = vmatpush3.bf16.msra.mxu1 %v2432_v5 }
  0x16   : > { %2127 = vmatprep.subr.bf16.mxu0 %v2447_v8  ;;  %2143 = vmatprep.subr.bf16.mxu1 %v2447_v8 }
  0x17   : > { %s1903_s11 = sshll.u32 %s183_s10, 2  ;;  %s1825_s10 = scalar_lea.sflag [#allocation3], %s174_s29 }
  0x18   : > { %s2458_s26 = scalar_lea.vmem %s3196_s0, %s1903_s11  ;;  %s2285_s11 = scalar_lea.vmem %s3156_s6, 64 }
  0x19   : > { %v227_v11 = vld [vmem:[%s2458_s26] sm:$0x1]  ;;  %v228_v12 = vld [vmem:[%s2458_s26 + $0x4] sm:$0x1]  ;;  %v229_v13 = vld [vmem:[%s2458_s26 + $0x8] sm:$0x1]  ;;  %2129 = vmatpush3.bf16.msra.mxu0 %v2447_v8  ;;  %2145 = vmatpush3.bf16.msra.mxu1 %v2447_v8  ;;  %p2286_p11 = scmp.ne.s32.totalorder %s3156_s6, %s2285_s11  ;;  %p2293_p1 = scmp.lt.s32.totalorder %s2291_s19, %s2285_s11 }
  0x1a   : > { %v230_v14 = vld [vmem:[%s2458_s26 + $0xc] sm:$0x1]  ;;  %v231_v15 = vld [vmem:[%s2458_s26 + $0x10] sm:$0x1]  ;;  %v232_v16 = vld [vmem:[%s2458_s26 + $0x14] sm:$0x1]  ;;  %2131 = vmatprep.subr.bf16.mxu0 %v2470_v17  ;;  %2147 = vmatprep.subr.bf16.mxu1 %v2470_v17 }
  0x1b   : > { %v233_v18 = vld [vmem:[%s2458_s26 + $0x18] sm:$0x1]  ;;  %v234_v19 = vld [vmem:[%s2458_s26 + $0x1c] sm:$0x1]  ;;  %v361_v20 = vrot.slane %v228_v12, 7  ;;  %v364_v21 = vrot.slane %v229_v13, 6  ;;  %p2287_p12 = pnand %p2286_p11, %p2405_p5  ;;  %p2294_p2 = por %p2293_p1, %p2292_p0 }
  0x1c   : > { %v367_v22 = vrot.slane %v230_v14, 5  ;;  %v370_v23 = vrot.slane %v231_v15, 4  ;;  %v373_v24 = vrot.slane %v232_v16, 3  ;;  %v647_v25 = vld [vmem:[%s2458_s26 + $0x1] sm:$0x1]  ;;  %v376_v27 = vrot.slane %v233_v18, 2 }
  0x1d   : > { %v363_v26 = vsel %vm362_vm0, %v361_v20, %v227_v11  ;;  %v379_v28 = vrot.slane %v234_v19, 1  ;;  %v648_v29 = vld [vmem:[%s2458_s26 + $0x5] sm:$0x1]  ;;  %v649_v30 = vld [vmem:[%s2458_s26 + $0x9] sm:$0x1]  ;;  %2133 = vmatpush3.bf16.msra.mxu0 %v2470_v17  ;;  %2149 = vmatpush3.bf16.msra.mxu1 %v2470_v17  ;;  %p2288_p13 = pneg %p2287_p12 }
  0x1e   : > { %v366_v31 = vsel %vm365_vm1, %v364_v21, %v363_v26  ;;  %v650_v32 = vld [vmem:[%s2458_s26 + $0xd] sm:$0x1]  ;;  %v651_v33 = vld [vmem:[%s2458_s26 + $0x11] sm:$0x1]  ;;  %v652_v34 = vld [vmem:[%s2458_s26 + $0x15] sm:$0x1]  ;;  %2151 = vmatprep.subr.bf16.mxu0 %v2426_v3  ;;  %2167 = vmatprep.subr.bf16.mxu1 %v2426_v3 }
  0x1f   : > { %v369_v35 = vsel %vm368_vm2, %v367_v22, %v366_v31  ;;  %v653_v36 = vld [vmem:[%s2458_s26 + $0x19] sm:$0x1]  ;;  %v654_v37 = vld [vmem:[%s2458_s26 + $0x1d] sm:$0x1]  ;;  %v775_v38 = vrot.slane %v648_v29, 7  ;;  %v777_v39 = vrot.slane %v649_v30, 6  ;;  %p2295_p3 = pnand %p2294_p2, %p2288_p13 }
  0x20   : > { %v372_v40 = vsel %vm371_vm3, %v370_v23, %v369_v35  ;;  %v779_v41 = vrot.slane %v650_v32, 5  ;;  %v781_v42 = vrot.slane %v651_v33, 4  ;;  %v783_v43 = vrot.slane %v652_v34, 3  ;;  %v235_v44 = vld [vmem:[%s2458_s26 + $0x20] sm:$0x1] }
  0x21   : > { %v375_v45 = vsel %vm374_vm4, %v373_v24, %v372_v40  ;;  %v776_v46 = vsel %vm362_vm0, %v775_v38, %v647_v25  ;;  %v785_v47 = vrot.slane %v653_v36, 2  ;;  %v787_v48 = vrot.slane %v654_v37, 1  ;;  %v236_v49 = vld [vmem:[%s2458_s26 + $0x24] sm:$0x1]  ;;  %v237_v50 = vld [vmem:[%s2458_s26 + $0x28] sm:$0x1] }
  0x22   : > { %v378_v51 = vsel %vm377_vm5, %v376_v27, %v375_v45  ;;  %v778_v52 = vsel %vm365_vm1, %v777_v39, %v776_v46  ;;  %v238_v53 = vld [vmem:[%s2458_s26 + $0x2c] sm:$0x1]  ;;  %v239_v54 = vld [vmem:[%s2458_s26 + $0x30] sm:$0x1]  ;;  %v240_v55 = vld [vmem:[%s2458_s26 + $0x34] sm:$0x1] }
  0x23   : > { %v381_v56 = vsel %vm380_vm6, %v379_v28, %v378_v51  ;;  %v780_v57 = vsel %vm368_vm2, %v779_v41, %v778_v52  ;;  %v241_v58 = vld [vmem:[%s2458_s26 + $0x38] sm:$0x1]  ;;  %v242_v59 = vld [vmem:[%s2458_s26 + $0x3c] sm:$0x1]  ;;  %v382_v60 = vrot.slane %v236_v49, 7  ;;  %v384_v61 = vrot.slane %v237_v50, 6 }
  0x24   : > { %2022 = vmatprep.mubr.msk.f32.mxu0 %vm480_vm7, %v381_v56  ;;  %v782_v62 = vsel %vm371_vm3, %v781_v42, %v780_v57  ;;  %v386_v63 = vrot.slane %v238_v53, 5  ;;  %v388_v0 = vrot.slane %v239_v54, 4  ;;  %v390_v1 = vrot.slane %v240_v55, 3  ;;  %v655_v2 = vld [vmem:[%s2458_s26 + $0x21] sm:$0x1] }
  0x25   : > { %v784_v4 = vsel %vm374_vm4, %v783_v43, %v782_v62  ;;  %v383_v6 = vsel %vm362_vm0, %v382_v60, %v235_v44  ;;  %v392_v7 = vrot.slane %v241_v58, 2  ;;  %v394_v9 = vrot.slane %v242_v59, 1  ;;  %v656_v10 = vld [vmem:[%s2458_s26 + $0x25] sm:$0x1]  ;;  %v657_v11 = vld [vmem:[%s2458_s26 + $0x29] sm:$0x1] }
  0x26   : > { %v786_v12 = vsel %vm377_vm5, %v785_v47, %v784_v4  ;;  %v385_v13 = vsel %vm365_vm1, %v384_v61, %v383_v6  ;;  %v658_v14 = vld [vmem:[%s2458_s26 + $0x2d] sm:$0x1]  ;;  %v659_v15 = vld [vmem:[%s2458_s26 + $0x31] sm:$0x1]  ;;  %v660_v16 = vld [vmem:[%s2458_s26 + $0x35] sm:$0x1] }
  0x27   : > { %v788_v18 = vsel %vm380_vm6, %v787_v48, %v786_v12  ;;  %v387_v19 = vsel %vm368_vm2, %v386_v63, %v385_v13  ;;  %v661_v20 = vld [vmem:[%s2458_s26 + $0x39] sm:$0x1]  ;;  %v662_v21 = vld [vmem:[%s2458_s26 + $0x3d] sm:$0x1]  ;;  %v789_v22 = vrot.slane %v656_v10, 7  ;;  %v791_v23 = vrot.slane %v657_v11, 6 }
  0x28   : > { %2050 = vmatprep.mubr.msk.f32.mxu1 %vm480_vm7, %v788_v18  ;;  %v389_v24 = vsel %vm371_vm3, %v388_v0, %v387_v19  ;;  %v793_v25 = vrot.slane %v658_v14, 5  ;;  %v795_v26 = vrot.slane %v659_v15, 4  ;;  %v797_v27 = vrot.slane %v660_v16, 3  ;;  %v243_v28 = vld [vmem:[%s2458_s26 + $0x40] sm:$0x1] }
  0x29   : > { %v391_v29 = vsel %vm374_vm4, %v390_v1, %v389_v24  ;;  %v790_v30 = vsel %vm362_vm0, %v789_v22, %v655_v2  ;;  %v799_v31 = vrot.slane %v661_v20, 2  ;;  %v801_v32 = vrot.slane %v662_v21, 1  ;;  %v244_v33 = vld [vmem:[%s2458_s26 + $0x44] sm:$0x1]  ;;  %v245_v34 = vld [vmem:[%s2458_s26 + $0x48] sm:$0x1] }
  0x2a   : > { %v393_v35 = vsel %vm377_vm5, %v392_v7, %v391_v29  ;;  %v792_v36 = vsel %vm365_vm1, %v791_v23, %v790_v30  ;;  %v246_v37 = vld [vmem:[%s2458_s26 + $0x4c] sm:$0x1]  ;;  %v247_v38 = vld [vmem:[%s2458_s26 + $0x50] sm:$0x1]  ;;  %v248_v39 = vld [vmem:[%s2458_s26 + $0x54] sm:$0x1] }
  0x2b   : > { %v395_v40 = vsel %vm380_vm6, %v394_v9, %v393_v35  ;;  %v794_v41 = vsel %vm368_vm2, %v793_v25, %v792_v36  ;;  %v249_v42 = vld [vmem:[%s2458_s26 + $0x58] sm:$0x1]  ;;  %v250_v43 = vld [vmem:[%s2458_s26 + $0x5c] sm:$0x1]  ;;  %v396_v44 = vrot.slane %v244_v33, 7  ;;  %v398_v45 = vrot.slane %v245_v34, 6 }
  0x2c   : > { %2023 = vmatmul.mubr.msk.f32.vlgmr.msra.gmra.mrb[0].mxu0 %vm480_vm7, %v395_v40  ;;  %v796_v46 = vsel %vm371_vm3, %v795_v26, %v794_v41  ;;  %v400_v47 = vrot.slane %v246_v37, 5  ;;  %v402_v48 = vrot.slane %v247_v38, 4  ;;  %v404_v49 = vrot.slane %v248_v39, 3  ;;  %v663_v50 = vld [vmem:[%s2458_s26 + $0x41] sm:$0x1] }
  0x2d   : > { %v798_v51 = vsel %vm374_vm4, %v797_v27, %v796_v46  ;;  %2153 = vmatpush3.bf16.msra.mxu0 %v2426_v3  ;;  %v397_v52 = vsel %vm362_vm0, %v396_v44, %v243_v28  ;;  %v406_v53 = vrot.slane %v249_v42, 2  ;;  %v408_v54 = vrot.slane %v250_v43, 1  ;;  %v664_v55 = vld [vmem:[%s2458_s26 + $0x45] sm:$0x1]  ;;  %v665_v56 = vld [vmem:[%s2458_s26 + $0x49] sm:$0x1] }
  0x2e   : > { %v800_v57 = vsel %vm377_vm5, %v799_v31, %v798_v51  ;;  %v399_v58 = vsel %vm365_vm1, %v398_v45, %v397_v52  ;;  %v666_v59 = vld [vmem:[%s2458_s26 + $0x4d] sm:$0x1]  ;;  %v667_v60 = vld [vmem:[%s2458_s26 + $0x51] sm:$0x1]  ;;  %v668_v61 = vld [vmem:[%s2458_s26 + $0x55] sm:$0x1]  ;;  %2155 = vmatprep.subr.bf16.mxu0 %v2432_v5 }
  0x2f   : > { %v802_v62 = vsel %vm380_vm6, %v801_v32, %v800_v57  ;;  %v401_v63 = vsel %vm368_vm2, %v400_v47, %v399_v58  ;;  %v669_v0 = vld [vmem:[%s2458_s26 + $0x59] sm:$0x1]  ;;  %v670_v1 = vld [vmem:[%s2458_s26 + $0x5d] sm:$0x1]  ;;  %v803_v2 = vrot.slane %v664_v55, 7  ;;  %v805_v4 = vrot.slane %v665_v56, 6 }
  0x30   : > { %2051 = vmatmul.mubr.msk.f32.vlgmr.msra.gmra.mrb[0].mxu1 %vm480_vm7, %v802_v62  ;;  %v403_v6 = vsel %vm371_vm3, %v402_v48, %v401_v63  ;;  %v807_v7 = vrot.slane %v666_v59, 5  ;;  %v809_v9 = vrot.slane %v667_v60, 4  ;;  %v811_v10 = vrot.slane %v668_v61, 3  ;;  %v251_v11 = vld [vmem:[%s2458_s26 + $0x60] sm:$0x1] }
  0x31   : > { %2169 = vmatpush3.bf16.msra.mxu1 %v2426_v3  ;;  %v405_v12 = vsel %vm374_vm4, %v404_v49, %v403_v6  ;;  %v804_v13 = vsel %vm362_vm0, %v803_v2, %v663_v50  ;;  %v813_v14 = vrot.slane %v669_v0, 2  ;;  %v815_v15 = vrot.slane %v670_v1, 1  ;;  %v252_v16 = vld [vmem:[%s2458_s26 + $0x64] sm:$0x1]  ;;  %v253_v18 = vld [vmem:[%s2458_s26 + $0x68] sm:$0x1]  ;;  %2157 = vmatpush3.bf16.msra.mxu0 %v2432_v5 }
  0x32   : > { %v407_v19 = vsel %vm377_vm5, %v406_v53, %v405_v12  ;;  %v806_v20 = vsel %vm365_vm1, %v805_v4, %v804_v13  ;;  %v254_v21 = vld [vmem:[%s2458_s26 + $0x6c] sm:$0x1]  ;;  %v255_v22 = vld [vmem:[%s2458_s26 + $0x70] sm:$0x1]  ;;  %v256_v3 = vld [vmem:[%s2458_s26 + $0x74] sm:$0x1]  ;;  %2171 = vmatprep.subr.bf16.mxu1 %v2432_v5  ;;  %2159 = vmatprep.subr.bf16.mxu0 %v2447_v8 }
  0x33   : > { %v409_v23 = vsel %vm380_vm6, %v408_v54, %v407_v19  ;;  %v808_v24 = vsel %vm368_vm2, %v807_v7, %v806_v20  ;;  %v257_v25 = vld [vmem:[%s2458_s26 + $0x78] sm:$0x1]  ;;  %v258_v26 = vld [vmem:[%s2458_s26 + $0x7c] sm:$0x1]  ;;  %v410_v27 = vrot.slane %v252_v16, 7  ;;  %v412_v28 = vrot.slane %v253_v18, 6 }
  0x34   : > { %2025 = vmatprep.mubr.msk.f32.mxu0 %vm480_vm7, %v409_v23  ;;  %v810_v29 = vsel %vm371_vm3, %v809_v9, %v808_v24  ;;  %v414_v30 = vrot.slane %v254_v21, 5  ;;  %v416_v31 = vrot.slane %v255_v22, 4  ;;  %v418_v32 = vrot.slane %v256_v3, 3  ;;  %v671_v33 = vld [vmem:[%s2458_s26 + $0x61] sm:$0x1] }
  0x35   : > { %v812_v34 = vsel %vm374_vm4, %v811_v10, %v810_v29  ;;  %v411_v35 = vsel %vm362_vm0, %v410_v27, %v251_v11  ;;  %v420_v36 = vrot.slane %v257_v25, 2  ;;  %v422_v37 = vrot.slane %v258_v26, 1  ;;  %v672_v38 = vld [vmem:[%s2458_s26 + $0x65] sm:$0x1]  ;;  %v673_v39 = vld [vmem:[%s2458_s26 + $0x69] sm:$0x1]  ;;  %2173 = vmatpush3.bf16.msra.mxu1 %v2432_v5  ;;  %2161 = vmatpush3.bf16.msra.mxu0 %v2447_v8 }
  0x36   : > { %v814_v40 = vsel %vm377_vm5, %v813_v14, %v812_v34  ;;  %v413_v41 = vsel %vm365_vm1, %v412_v28, %v411_v35  ;;  %v674_v42 = vld [vmem:[%s2458_s26 + $0x6d] sm:$0x1]  ;;  %v675_v43 = vld [vmem:[%s2458_s26 + $0x71] sm:$0x1]  ;;  %v676_v44 = vld [vmem:[%s2458_s26 + $0x75] sm:$0x1]  ;;  %2175 = vmatprep.subr.bf16.mxu1 %v2447_v8  ;;  %2163 = vmatprep.subr.bf16.mxu0 %v2470_v17 }
  0x37   : > { %v816_v45 = vsel %vm380_vm6, %v815_v15, %v814_v40  ;;  %v415_v46 = vsel %vm368_vm2, %v414_v30, %v413_v41  ;;  %v677_v5 = vld [vmem:[%s2458_s26 + $0x79] sm:$0x1]  ;;  %v678_v47 = vld [vmem:[%s2458_s26 + $0x7d] sm:$0x1]  ;;  %v817_v48 = vrot.slane %v672_v38, 7  ;;  %v819_v49 = vrot.slane %v673_v39, 6 }
  0x38   : > { %2053 = vmatprep.mubr.msk.f32.mxu1 %vm480_vm7, %v816_v45  ;;  %v417_v50 = vsel %vm371_vm3, %v416_v31, %v415_v46  ;;  %v821_v51 = vrot.slane %v674_v42, 5  ;;  %v823_v52 = vrot.slane %v675_v43, 4  ;;  %v825_v53 = vrot.slane %v676_v44, 3  ;;  %v259_v54 = vld [vmem:[%s2458_s26 + $0x80] sm:$0x1] }
  0x39   : > { %v419_v55 = vsel %vm374_vm4, %v418_v32, %v417_v50  ;;  %v818_v56 = vsel %vm362_vm0, %v817_v48, %v671_v33  ;;  %v827_v57 = vrot.slane %v677_v5, 2  ;;  %v829_v58 = vrot.slane %v678_v47, 1  ;;  %v260_v59 = vld [vmem:[%s2458_s26 + $0x84] sm:$0x1]  ;;  %v261_v60 = vld [vmem:[%s2458_s26 + $0x88] sm:$0x1]  ;;  %2177 = vmatpush3.bf16.msra.mxu1 %v2447_v8  ;;  %2165 = vmatpush3.bf16.msra.mxu0 %v2470_v17 }
  0x3a   : > { %v421_v61 = vsel %vm377_vm5, %v420_v36, %v419_v55  ;;  %v820_v62 = vsel %vm365_vm1, %v819_v49, %v818_v56  ;;  %v262_v63 = vld [vmem:[%s2458_s26 + $0x8c] sm:$0x1]  ;;  %v263_v0 = vld [vmem:[%s2458_s26 + $0x90] sm:$0x1]  ;;  %v264_v1 = vld [vmem:[%s2458_s26 + $0x94] sm:$0x1]  ;;  %2179 = vmatprep.subr.bf16.mxu1 %v2470_v17 }
  0x3b   : > { %v423_v2 = vsel %vm380_vm6, %v422_v37, %v421_v61  ;;  %v822_v4 = vsel %vm368_vm2, %v821_v51, %v820_v62  ;;  %v265_v6 = vld [vmem:[%s2458_s26 + $0x98] sm:$0x1]  ;;  %v266_v8 = vld [vmem:[%s2458_s26 + $0x9c] sm:$0x1]  ;;  %v424_v7 = vrot.slane %v260_v59, 7  ;;  %v426_v9 = vrot.slane %v261_v60, 6 }
  0x3c   : > { %2026 = vmatmul.mubr.msk.f32.gmra.mrb[2].mxu0 %vm480_vm7, %v423_v2  ;;  %v824_v10 = vsel %vm371_vm3, %v823_v52, %v822_v4  ;;  %v428_v11 = vrot.slane %v262_v63, 5  ;;  %v430_v12 = vrot.slane %v263_v0, 4  ;;  %v432_v13 = vrot.slane %v264_v1, 3  ;;  %v679_v14 = vld [vmem:[%s2458_s26 + $0x81] sm:$0x1] }
  0x3d   : > { %v826_v15 = vsel %vm374_vm4, %v825_v53, %v824_v10  ;;  %v425_v16 = vsel %vm362_vm0, %v424_v7, %v259_v54  ;;  %v434_v18 = vrot.slane %v265_v6, 2  ;;  %v436_v19 = vrot.slane %v266_v8, 1  ;;  %v680_v20 = vld [vmem:[%s2458_s26 + $0x85] sm:$0x1]  ;;  %v681_v21 = vld [vmem:[%s2458_s26 + $0x89] sm:$0x1]  ;;  %2181 = vmatpush3.bf16.msra.mxu1 %v2470_v17 }
  0x3e   : > { %v828_v22 = vsel %vm377_vm5, %v827_v57, %v826_v15  ;;  %v427_v3 = vsel %vm365_vm1, %v426_v9, %v425_v16  ;;  %v682_v23 = vld [vmem:[%s2458_s26 + $0x8d] sm:$0x1]  ;;  %v683_v24 = vld [vmem:[%s2458_s26 + $0x91] sm:$0x1]  ;;  %v684_v25 = vld [vmem:[%s2458_s26 + $0x95] sm:$0x1] }
  0x3f   : > { %v830_v26 = vsel %vm380_vm6, %v829_v58, %v828_v22  ;;  %v429_v27 = vsel %vm368_vm2, %v428_v11, %v427_v3  ;;  %v685_v28 = vld [vmem:[%s2458_s26 + $0x99] sm:$0x1]  ;;  %v686_v29 = vld [vmem:[%s2458_s26 + $0x9d] sm:$0x1]  ;;  %v831_v30 = vrot.slane %v680_v20, 7  ;;  %v833_v31 = vrot.slane %v681_v21, 6 }
  0x40   : > { %2054 = vmatmul.mubr.msk.f32.gmra.mrb[2].mxu1 %vm480_vm7, %v830_v26  ;;  %v431_v17 = vsel %vm371_vm3, %v430_v12, %v429_v27  ;;  %v835_v32 = vrot.slane %v682_v23, 5  ;;  %v837_v33 = vrot.slane %v683_v24, 4  ;;  %v839_v34 = vrot.slane %v684_v25, 3  ;;  %v267_v35 = vld [vmem:[%s2458_s26 + $0xa0] sm:$0x1] }
  0x41   : > { %v433_v36 = vsel %vm374_vm4, %v432_v13, %v431_v17  ;;  %v832_v37 = vsel %vm362_vm0, %v831_v30, %v679_v14  ;;  %v841_v38 = vrot.slane %v685_v28, 2  ;;  %v843_v39 = vrot.slane %v686_v29, 1  ;;  %v268_v40 = vld [vmem:[%s2458_s26 + $0xa4] sm:$0x1]  ;;  %v269_v41 = vld [vmem:[%s2458_s26 + $0xa8] sm:$0x1] }
  0x42   : > { %v435_v42 = vsel %vm377_vm5, %v434_v18, %v433_v36  ;;  %v834_v43 = vsel %vm365_vm1, %v833_v31, %v832_v37  ;;  %v270_v44 = vld [vmem:[%s2458_s26 + $0xac] sm:$0x1]  ;;  %v271_v45 = vld [vmem:[%s2458_s26 + $0xb0] sm:$0x1]  ;;  %v272_v46 = vld [vmem:[%s2458_s26 + $0xb4] sm:$0x1] }
  0x43   : > { %v437_v5 = vsel %vm380_vm6, %v436_v19, %v435_v42  ;;  %v836_v47 = vsel %vm368_vm2, %v835_v32, %v834_v43  ;;  %v273_v48 = vld [vmem:[%s2458_s26 + $0xb8] sm:$0x1]  ;;  %v274_v49 = vld [vmem:[%s2458_s26 + $0xbc] sm:$0x1]  ;;  %v438_v50 = vrot.slane %v268_v40, 7  ;;  %v440_v51 = vrot.slane %v269_v41, 6 }
  0x44   : > { %2028 = vmatprep.mubr.msk.f32.mxu0 %vm480_vm7, %v437_v5  ;;  %v838_v52 = vsel %vm371_vm3, %v837_v33, %v836_v47  ;;  %v442_v53 = vrot.slane %v270_v44, 5  ;;  %v444_v54 = vrot.slane %v271_v45, 4  ;;  %v446_v55 = vrot.slane %v272_v46, 3  ;;  %v687_v56 = vld [vmem:[%s2458_s26 + $0xa1] sm:$0x1] }
  0x45   : > { %v840_v57 = vsel %vm374_vm4, %v839_v34, %v838_v52  ;;  %v439_v58 = vsel %vm362_vm0, %v438_v50, %v267_v35  ;;  %v448_v59 = vrot.slane %v273_v48, 2  ;;  %v450_v60 = vrot.slane %v274_v49, 1  ;;  %v688_v61 = vld [vmem:[%s2458_s26 + $0xa5] sm:$0x1]  ;;  %v689_v62 = vld [vmem:[%s2458_s26 + $0xa9] sm:$0x1] }
  0x46   : > { %v842_v63 = vsel %vm377_vm5, %v841_v38, %v840_v57  ;;  %v441_v0 = vsel %vm365_vm1, %v440_v51, %v439_v58  ;;  %v690_v1 = vld [vmem:[%s2458_s26 + $0xad] sm:$0x1]  ;;  %v691_v2 = vld [vmem:[%s2458_s26 + $0xb1] sm:$0x1]  ;;  %v692_v4 = vld [vmem:[%s2458_s26 + $0xb5] sm:$0x1] }
  0x47   : > { %v844_v6 = vsel %vm380_vm6, %v843_v39, %v842_v63  ;;  %v443_v8 = vsel %vm368_vm2, %v442_v53, %v441_v0  ;;  %v693_v7 = vld [vmem:[%s2458_s26 + $0xb9] sm:$0x1]  ;;  %v694_v9 = vld [vmem:[%s2458_s26 + $0xbd] sm:$0x1]  ;;  %v845_v10 = vrot.slane %v688_v61, 7  ;;  %v847_v11 = vrot.slane %v689_v62, 6 }
  0x48   : > { %2056 = vmatprep.mubr.msk.f32.mxu1 %vm480_vm7, %v844_v6  ;;  %v445_v12 = vsel %vm371_vm3, %v444_v54, %v443_v8  ;;  %v849_v13 = vrot.slane %v690_v1, 5  ;;  %v851_v14 = vrot.slane %v691_v2, 4  ;;  %v853_v15 = vrot.slane %v692_v4, 3  ;;  %v275_v16 = vld [vmem:[%s2458_s26 + $0xc0] sm:$0x1] }
  0x49   : > { %v447_v18 = vsel %vm374_vm4, %v446_v55, %v445_v12  ;;  %v846_v19 = vsel %vm362_vm0, %v845_v10, %v687_v56  ;;  %v855_v20 = vrot.slane %v693_v7, 2  ;;  %v857_v21 = vrot.slane %v694_v9, 1  ;;  %v276_v22 = vld [vmem:[%s2458_s26 + $0xc4] sm:$0x1]  ;;  %v277_v3 = vld [vmem:[%s2458_s26 + $0xc8] sm:$0x1] }
  0x4a   : > { %v449_v23 = vsel %vm377_vm5, %v448_v59, %v447_v18  ;;  %v848_v24 = vsel %vm365_vm1, %v847_v11, %v846_v19  ;;  %v278_v25 = vld [vmem:[%s2458_s26 + $0xcc] sm:$0x1]  ;;  %v279_v26 = vld [vmem:[%s2458_s26 + $0xd0] sm:$0x1]  ;;  %v280_v27 = vld [vmem:[%s2458_s26 + $0xd4] sm:$0x1] }
  0x4b   : > { %v451_v28 = vsel %vm380_vm6, %v450_v60, %v449_v23  ;;  %v850_v29 = vsel %vm368_vm2, %v849_v13, %v848_v24  ;;  %v281_v30 = vld [vmem:[%s2458_s26 + $0xd8] sm:$0x1]  ;;  %v282_v31 = vld [vmem:[%s2458_s26 + $0xdc] sm:$0x1]  ;;  %v452_v17 = vrot.slane %v276_v22, 7  ;;  %v454_v32 = vrot.slane %v277_v3, 6 }
  0x4c   : > { %2029 = vmatmul.mubr.msk.f32.gmra.mrb[4].mxu0 %vm480_vm7, %v451_v28  ;;  %v852_v33 = vsel %vm371_vm3, %v851_v14, %v850_v29  ;;  %v456_v34 = vrot.slane %v278_v25, 5  ;;  %v458_v35 = vrot.slane %v279_v26, 4  ;;  %v460_v36 = vrot.slane %v280_v27, 3  ;;  %v695_v37 = vld [vmem:[%s2458_s26 + $0xc1] sm:$0x1] }
  0x4d   : > { %v854_v38 = vsel %vm374_vm4, %v853_v15, %v852_v33  ;;  %v453_v39 = vsel %vm362_vm0, %v452_v17, %v275_v16  ;;  %v462_v40 = vrot.slane %v281_v30, 2  ;;  %v464_v41 = vrot.slane %v282_v31, 1  ;;  %v696_v42 = vld [vmem:[%s2458_s26 + $0xc5] sm:$0x1]  ;;  %v697_v43 = vld [vmem:[%s2458_s26 + $0xc9] sm:$0x1] }
  0x4e   : > { %v856_v44 = vsel %vm377_vm5, %v855_v20, %v854_v38  ;;  %v455_v45 = vsel %vm365_vm1, %v454_v32, %v453_v39  ;;  %v698_v46 = vld [vmem:[%s2458_s26 + $0xcd] sm:$0x1]  ;;  %v699_v5 = vld [vmem:[%s2458_s26 + $0xd1] sm:$0x1]  ;;  %v700_v47 = vld [vmem:[%s2458_s26 + $0xd5] sm:$0x1] }
  0x4f   : > { %v858_v48 = vsel %vm380_vm6, %v857_v21, %v856_v44  ;;  %v457_v49 = vsel %vm368_vm2, %v456_v34, %v455_v45  ;;  %v701_v50 = vld [vmem:[%s2458_s26 + $0xd9] sm:$0x1]  ;;  %v702_v51 = vld [vmem:[%s2458_s26 + $0xdd] sm:$0x1]  ;;  %v859_v52 = vrot.slane %v696_v42, 7  ;;  %v861_v53 = vrot.slane %v697_v43, 6 }
  0x50   : > { %2057 = vmatmul.mubr.msk.f32.gmra.mrb[4].mxu1 %vm480_vm7, %v858_v48  ;;  %v459_v54 = vsel %vm371_vm3, %v458_v35, %v457_v49  ;;  %v863_v55 = vrot.slane %v698_v46, 5  ;;  %v865_v56 = vrot.slane %v699_v5, 4  ;;  %v867_v57 = vrot.slane %v700_v47, 3  ;;  %v283_v58 = vld [vmem:[%s2458_s26 + $0xe0] sm:$0x1] }
  0x51   : > { %v461_v59 = vsel %vm374_vm4, %v460_v36, %v459_v54  ;;  %v860_v60 = vsel %vm362_vm0, %v859_v52, %v695_v37  ;;  %v869_v61 = vrot.slane %v701_v50, 2  ;;  %v871_v62 = vrot.slane %v702_v51, 1  ;;  %v284_v63 = vld [vmem:[%s2458_s26 + $0xe4] sm:$0x1]  ;;  %v285_v0 = vld [vmem:[%s2458_s26 + $0xe8] sm:$0x1] }
  0x52   : > { %v463_v1 = vsel %vm377_vm5, %v462_v40, %v461_v59  ;;  %v862_v2 = vsel %vm365_vm1, %v861_v53, %v860_v60  ;;  %v286_v4 = vld [vmem:[%s2458_s26 + $0xec] sm:$0x1]  ;;  %v287_v6 = vld [vmem:[%s2458_s26 + $0xf0] sm:$0x1]  ;;  %v288_v8 = vld [vmem:[%s2458_s26 + $0xf4] sm:$0x1] }
  0x53   : > { %v465_v7 = vsel %vm380_vm6, %v464_v41, %v463_v1  ;;  %v864_v9 = vsel %vm368_vm2, %v863_v55, %v862_v2  ;;  %v289_v10 = vld [vmem:[%s2458_s26 + $0xf8] sm:$0x1]  ;;  %v290_v11 = vld [vmem:[%s2458_s26 + $0xfc] sm:$0x1]  ;;  %v466_v12 = vrot.slane %v284_v63, 7  ;;  %v468_v13 = vrot.slane %v285_v0, 6 }
  0x54   : > { %2031 = vmatprep.mubr.msk.f32.mxu0 %vm480_vm7, %v465_v7  ;;  %v866_v14 = vsel %vm371_vm3, %v865_v56, %v864_v9  ;;  %v470_v15 = vrot.slane %v286_v4, 5  ;;  %v472_v16 = vrot.slane %v287_v6, 4  ;;  %v474_v18 = vrot.slane %v288_v8, 3  ;;  %v703_v19 = vld [vmem:[%s2458_s26 + $0xe1] sm:$0x1] }
  0x55   : > { %v868_v20 = vsel %vm374_vm4, %v867_v57, %v866_v14  ;;  %v467_v21 = vsel %vm362_vm0, %v466_v12, %v283_v58  ;;  %v476_v22 = vrot.slane %v289_v10, 2  ;;  %v478_v3 = vrot.slane %v290_v11, 1  ;;  %v704_v23 = vld [vmem:[%s2458_s26 + $0xe5] sm:$0x1]  ;;  %v705_v24 = vld [vmem:[%s2458_s26 + $0xe9] sm:$0x1] }
  0x56   : > { %v870_v25 = vsel %vm377_vm5, %v869_v61, %v868_v20  ;;  %v469_v26 = vsel %vm365_vm1, %v468_v13, %v467_v21  ;;  %v706_v27 = vld [vmem:[%s2458_s26 + $0xed] sm:$0x1]  ;;  %v707_v28 = vld [vmem:[%s2458_s26 + $0xf1] sm:$0x1]  ;;  %v708_v29 = vld [vmem:[%s2458_s26 + $0xf5] sm:$0x1] }
  0x57   : > { %v872_v30 = vsel %vm380_vm6, %v871_v62, %v870_v25  ;;  %v471_v31 = vsel %vm368_vm2, %v470_v15, %v469_v26  ;;  %v709_v17 = vld [vmem:[%s2458_s26 + $0xf9] sm:$0x1]  ;;  %v710_v32 = vld [vmem:[%s2458_s26 + $0xfd] sm:$0x1]  ;;  %v873_v33 = vrot.slane %v704_v23, 7  ;;  %v875_v34 = vrot.slane %v705_v24, 6 }
  0x58   : > { %2059 = vmatprep.mubr.msk.f32.mxu1 %vm480_vm7, %v872_v30  ;;  %v473_v35 = vsel %vm371_vm3, %v472_v16, %v471_v31  ;;  %v877_v36 = vrot.slane %v706_v27, 5  ;;  %v879_v37 = vrot.slane %v707_v28, 4  ;;  %v881_v38 = vrot.slane %v708_v29, 3  ;;  %v1037_v39 = vld [vmem:[%s2458_s26 + $0x2] sm:$0x1] }
  0x59   : > { %v475_v40 = vsel %vm374_vm4, %v474_v18, %v473_v35  ;;  %v874_v41 = vsel %vm362_vm0, %v873_v33, %v703_v19  ;;  %v883_v42 = vrot.slane %v709_v17, 2  ;;  %v885_v43 = vrot.slane %v710_v32, 1  ;;  %v1038_v44 = vld [vmem:[%s2458_s26 + $0x6] sm:$0x1]  ;;  %v1039_v45 = vld [vmem:[%s2458_s26 + $0xa] sm:$0x1] }
  0x5a   : > { %v477_v46 = vsel %vm377_vm5, %v476_v22, %v475_v40  ;;  %v876_v5 = vsel %vm365_vm1, %v875_v34, %v874_v41  ;;  %v1040_v47 = vld [vmem:[%s2458_s26 + $0xe] sm:$0x1]  ;;  %v1041_v48 = vld [vmem:[%s2458_s26 + $0x12] sm:$0x1]  ;;  %v1042_v49 = vld [vmem:[%s2458_s26 + $0x16] sm:$0x1] }
  0x5b   : > { %v479_v50 = vsel %vm380_vm6, %v478_v3, %v477_v46  ;;  %v878_v51 = vsel %vm368_vm2, %v877_v36, %v876_v5  ;;  %v1043_v52 = vld [vmem:[%s2458_s26 + $0x1a] sm:$0x1]  ;;  %v1044_v53 = vld [vmem:[%s2458_s26 + $0x1e] sm:$0x1]  ;;  %v1165_v54 = vrot.slane %v1038_v44, 7  ;;  %v1167_v55 = vrot.slane %v1039_v45, 6 }
  0x5c   : > { %2032 = vmatmul.mubr.msk.f32.gmra.mrb[6].mxu0 %vm480_vm7, %v479_v50  ;;  %v880_v56 = vsel %vm371_vm3, %v879_v37, %v878_v51  ;;  %v1169_v57 = vrot.slane %v1040_v47, 5  ;;  %v1171_v58 = vrot.slane %v1041_v48, 4  ;;  %v1173_v59 = vrot.slane %v1042_v49, 3  ;;  %v1427_v60 = vld [vmem:[%s2458_s26 + $0x3] sm:$0x1] }
  0x5d   : > { %v882_v61 = vsel %vm374_vm4, %v881_v38, %v880_v56  ;;  %v1166_v62 = vsel %vm362_vm0, %v1165_v54, %v1037_v39  ;;  %v1175_v63 = vrot.slane %v1043_v52, 2  ;;  %v1177_v0 = vrot.slane %v1044_v53, 1  ;;  %v1428_v1 = vld [vmem:[%s2458_s26 + $0x7] sm:$0x1]  ;;  %v1429_v2 = vld [vmem:[%s2458_s26 + $0xb] sm:$0x1] }
  0x5e   : > { %v884_v4 = vsel %vm377_vm5, %v883_v42, %v882_v61  ;;  %v1168_v6 = vsel %vm365_vm1, %v1167_v55, %v1166_v62  ;;  %v1430_v8 = vld [vmem:[%s2458_s26 + $0xf] sm:$0x1]  ;;  %v1431_v7 = vld [vmem:[%s2458_s26 + $0x13] sm:$0x1]  ;;  %v1432_v9 = vld [vmem:[%s2458_s26 + $0x17] sm:$0x1] }
  0x5f   : > { %v886_v10 = vsel %vm380_vm6, %v885_v43, %v884_v4  ;;  %v1170_v11 = vsel %vm368_vm2, %v1169_v57, %v1168_v6  ;;  %v1433_v12 = vld [vmem:[%s2458_s26 + $0x1b] sm:$0x1]  ;;  %v1434_v13 = vld [vmem:[%s2458_s26 + $0x1f] sm:$0x1]  ;;  %v1555_v14 = vrot.slane %v1428_v1, 7  ;;  %v1557_v15 = vrot.slane %v1429_v2, 6 }
  0x60   : > { %2060 = vmatmul.mubr.msk.f32.gmra.mrb[6].mxu1 %vm480_vm7, %v886_v10  ;;  %v1172_v16 = vsel %vm371_vm3, %v1171_v58, %v1170_v11  ;;  %v1559_v18 = vrot.slane %v1430_v8, 5  ;;  %v1561_v19 = vrot.slane %v1431_v7, 4  ;;  %v1563_v20 = vrot.slane %v1432_v9, 3  ;;  %v1045_v21 = vld [vmem:[%s2458_s26 + $0x22] sm:$0x1] }
  0x61   : > { %v1174_v22 = vsel %vm374_vm4, %v1173_v59, %v1172_v16  ;;  %v1556_v3 = vsel %vm362_vm0, %v1555_v14, %v1427_v60  ;;  %v1565_v23 = vrot.slane %v1433_v12, 2  ;;  %v1567_v24 = vrot.slane %v1434_v13, 1  ;;  %v1046_v25 = vld [vmem:[%s2458_s26 + $0x26] sm:$0x1]  ;;  %v1047_v26 = vld [vmem:[%s2458_s26 + $0x2a] sm:$0x1] }
  0x62   : > { %v1176_v27 = vsel %vm377_vm5, %v1175_v63, %v1174_v22  ;;  %v1558_v28 = vsel %vm365_vm1, %v1557_v15, %v1556_v3  ;;  %v1048_v29 = vld [vmem:[%s2458_s26 + $0x2e] sm:$0x1]  ;;  %v1049_v30 = vld [vmem:[%s2458_s26 + $0x32] sm:$0x1]  ;;  %v1050_v31 = vld [vmem:[%s2458_s26 + $0x36] sm:$0x1] }
  0x63   : > { %v1178_v17 = vsel %vm380_vm6, %v1177_v0, %v1176_v27  ;;  %v1560_v32 = vsel %vm368_vm2, %v1559_v18, %v1558_v28  ;;  %v1051_v33 = vld [vmem:[%s2458_s26 + $0x3a] sm:$0x1]  ;;  %v1052_v34 = vld [vmem:[%s2458_s26 + $0x3e] sm:$0x1]  ;;  %v1179_v35 = vrot.slane %v1046_v25, 7  ;;  %v1181_v36 = vrot.slane %v1047_v26, 6 }
  0x64   : > { %2078 = vmatprep.mubr.msk.f32.mxu0 %vm480_vm7, %v1178_v17  ;;  %v1562_v37 = vsel %vm371_vm3, %v1561_v19, %v1560_v32  ;;  %v1183_v38 = vrot.slane %v1048_v29, 5  ;;  %v1185_v39 = vrot.slane %v1049_v30, 4  ;;  %v1187_v40 = vrot.slane %v1050_v31, 3  ;;  %v1435_v41 = vld [vmem:[%s2458_s26 + $0x23] sm:$0x1] }
  0x65   : > { %v1564_v42 = vsel %vm374_vm4, %v1563_v20, %v1562_v37  ;;  %v1180_v43 = vsel %vm362_vm0, %v1179_v35, %v1045_v21  ;;  %v1189_v44 = vrot.slane %v1051_v33, 2  ;;  %v1191_v45 = vrot.slane %v1052_v34, 1  ;;  %v1436_v46 = vld [vmem:[%s2458_s26 + $0x27] sm:$0x1]  ;;  %v1437_v5 = vld [vmem:[%s2458_s26 + $0x2b] sm:$0x1] }
  0x66   : > { %v1566_v47 = vsel %vm377_vm5, %v1565_v23, %v1564_v42  ;;  %v1182_v48 = vsel %vm365_vm1, %v1181_v36, %v1180_v43  ;;  %v1438_v49 = vld [vmem:[%s2458_s26 + $0x2f] sm:$0x1]  ;;  %v1439_v50 = vld [vmem:[%s2458_s26 + $0x33] sm:$0x1]  ;;  %v1440_v51 = vld [vmem:[%s2458_s26 + $0x37] sm:$0x1] }
  0x67   : > { %v1568_v52 = vsel %vm380_vm6, %v1567_v24, %v1566_v47  ;;  %v1184_v53 = vsel %vm368_vm2, %v1183_v38, %v1182_v48  ;;  %v1441_v54 = vld [vmem:[%s2458_s26 + $0x3b] sm:$0x1]  ;;  %v1442_v55 = vld [vmem:[%s2458_s26 + $0x3f] sm:$0x1]  ;;  %v1569_v56 = vrot.slane %v1436_v46, 7  ;;  %v1571_v57 = vrot.slane %v1437_v5, 6 }
  0x68   : > { %2106 = vmatprep.mubr.msk.f32.mxu1 %vm480_vm7, %v1568_v52  ;;  %v1186_v58 = vsel %vm371_vm3, %v1185_v39, %v1184_v53  ;;  %v1573_v59 = vrot.slane %v1438_v49, 5  ;;  %v1575_v60 = vrot.slane %v1439_v50, 4  ;;  %v1577_v61 = vrot.slane %v1440_v51, 3  ;;  %v1053_v62 = vld [vmem:[%s2458_s26 + $0x42] sm:$0x1] }
  0x69   : > { %v1188_v63 = vsel %vm374_vm4, %v1187_v40, %v1186_v58  ;;  %v1570_v0 = vsel %vm362_vm0, %v1569_v56, %v1435_v41  ;;  %v1579_v1 = vrot.slane %v1441_v54, 2  ;;  %v1581_v2 = vrot.slane %v1442_v55, 1  ;;  %v1054_v4 = vld [vmem:[%s2458_s26 + $0x46] sm:$0x1]  ;;  %v1055_v6 = vld [vmem:[%s2458_s26 + $0x4a] sm:$0x1] }
  0x6a   : > { %v1190_v8 = vsel %vm377_vm5, %v1189_v44, %v1188_v63  ;;  %v1572_v7 = vsel %vm365_vm1, %v1571_v57, %v1570_v0  ;;  %v1056_v9 = vld [vmem:[%s2458_s26 + $0x4e] sm:$0x1]  ;;  %v1057_v10 = vld [vmem:[%s2458_s26 + $0x52] sm:$0x1]  ;;  %v1058_v11 = vld [vmem:[%s2458_s26 + $0x56] sm:$0x1] }
  0x6b   : > { %v1192_v12 = vsel %vm380_vm6, %v1191_v45, %v1190_v8  ;;  %v1574_v13 = vsel %vm368_vm2, %v1573_v59, %v1572_v7  ;;  %v1059_v14 = vld [vmem:[%s2458_s26 + $0x5a] sm:$0x1]  ;;  %v1060_v15 = vld [vmem:[%s2458_s26 + $0x5e] sm:$0x1]  ;;  %v1193_v16 = vrot.slane %v1054_v4, 7  ;;  %v1195_v18 = vrot.slane %v1055_v6, 6 }
  0x6c   : > { %2079 = vmatmul.mubr.msk.f32.vlgmr.msra.gmra.mrb[8].mxu0 %vm480_vm7, %v1192_v12  ;;  %v1576_v19 = vsel %vm371_vm3, %v1575_v60, %v1574_v13  ;;  %v1197_v20 = vrot.slane %v1056_v9, 5  ;;  %v1199_v21 = vrot.slane %v1057_v10, 4  ;;  %v1201_v22 = vrot.slane %v1058_v11, 3  ;;  %v1443_v3 = vld [vmem:[%s2458_s26 + $0x43] sm:$0x1] }
  0x6d   : > { %v1578_v23 = vsel %vm374_vm4, %v1577_v61, %v1576_v19  ;;  %v1194_v24 = vsel %vm362_vm0, %v1193_v16, %v1053_v62  ;;  %v1203_v25 = vrot.slane %v1059_v14, 2  ;;  %v1205_v26 = vrot.slane %v1060_v15, 1  ;;  %v1444_v27 = vld [vmem:[%s2458_s26 + $0x47] sm:$0x1]  ;;  %v1445_v28 = vld [vmem:[%s2458_s26 + $0x4b] sm:$0x1] }
  0x6e   : > { %v1580_v29 = vsel %vm377_vm5, %v1579_v1, %v1578_v23  ;;  %v1196_v30 = vsel %vm365_vm1, %v1195_v18, %v1194_v24  ;;  %v1446_v31 = vld [vmem:[%s2458_s26 + $0x4f] sm:$0x1]  ;;  %v1447_v17 = vld [vmem:[%s2458_s26 + $0x53] sm:$0x1]  ;;  %v1448_v32 = vld [vmem:[%s2458_s26 + $0x57] sm:$0x1] }
  0x6f   : > { %v1582_v33 = vsel %vm380_vm6, %v1581_v2, %v1580_v29  ;;  %v1198_v34 = vsel %vm368_vm2, %v1197_v20, %v1196_v30  ;;  %v1449_v35 = vld [vmem:[%s2458_s26 + $0x5b] sm:$0x1]  ;;  %v1450_v36 = vld [vmem:[%s2458_s26 + $0x5f] sm:$0x1]  ;;  %v1583_v37 = vrot.slane %v1444_v27, 7  ;;  %v1585_v38 = vrot.slane %v1445_v28, 6 }
  0x70   : > { %2107 = vmatmul.mubr.msk.f32.vlgmr.msra.gmra.mrb[8].mxu1 %vm480_vm7, %v1582_v33  ;;  %v1200_v39 = vsel %vm371_vm3, %v1199_v21, %v1198_v34  ;;  %v1587_v40 = vrot.slane %v1446_v31, 5  ;;  %v1589_v41 = vrot.slane %v1447_v17, 4  ;;  %v1591_v42 = vrot.slane %v1448_v32, 3  ;;  %v1061_v43 = vld [vmem:[%s2458_s26 + $0x62] sm:$0x1] }
  0x71   : > { %v1202_v44 = vsel %vm374_vm4, %v1201_v22, %v1200_v39  ;;  %v1584_v45 = vsel %vm362_vm0, %v1583_v37, %v1443_v3  ;;  %v1593_v46 = vrot.slane %v1449_v35, 2  ;;  %v1595_v5 = vrot.slane %v1450_v36, 1  ;;  %v1062_v47 = vld [vmem:[%s2458_s26 + $0x66] sm:$0x1]  ;;  %v1063_v48 = vld [vmem:[%s2458_s26 + $0x6a] sm:$0x1] }
  0x72   : > { %v1204_v49 = vsel %vm377_vm5, %v1203_v25, %v1202_v44  ;;  %v1586_v50 = vsel %vm365_vm1, %v1585_v38, %v1584_v45  ;;  %v1064_v51 = vld [vmem:[%s2458_s26 + $0x6e] sm:$0x1]  ;;  %v1065_v52 = vld [vmem:[%s2458_s26 + $0x72] sm:$0x1]  ;;  %v1066_v53 = vld [vmem:[%s2458_s26 + $0x76] sm:$0x1] }
  0x73   : > { %v1206_v54 = vsel %vm380_vm6, %v1205_v26, %v1204_v49  ;;  %v1588_v55 = vsel %vm368_vm2, %v1587_v40, %v1586_v50  ;;  %v1067_v56 = vld [vmem:[%s2458_s26 + $0x7a] sm:$0x1]  ;;  %v1068_v57 = vld [vmem:[%s2458_s26 + $0x7e] sm:$0x1]  ;;  %v1207_v58 = vrot.slane %v1062_v47, 7  ;;  %v1209_v59 = vrot.slane %v1063_v48, 6 }
  0x74   : > { %2081 = vmatprep.mubr.msk.f32.mxu0 %vm480_vm7, %v1206_v54  ;;  %v1590_v60 = vsel %vm371_vm3, %v1589_v41, %v1588_v55  ;;  %v1211_v61 = vrot.slane %v1064_v51, 5  ;;  %v1213_v62 = vrot.slane %v1065_v52, 4  ;;  %v1215_v63 = vrot.slane %v1066_v53, 3  ;;  %v1451_v0 = vld [vmem:[%s2458_s26 + $0x63] sm:$0x1] }
  0x75   : > { %v1592_v1 = vsel %vm374_vm4, %v1591_v42, %v1590_v60  ;;  %v1208_v2 = vsel %vm362_vm0, %v1207_v58, %v1061_v43  ;;  %v1217_v4 = vrot.slane %v1067_v56, 2  ;;  %v1219_v6 = vrot.slane %v1068_v57, 1  ;;  %v1452_v8 = vld [vmem:[%s2458_s26 + $0x67] sm:$0x1]  ;;  %v1453_v7 = vld [vmem:[%s2458_s26 + $0x6b] sm:$0x1] }
  0x76   : > { %v1594_v9 = vsel %vm377_vm5, %v1593_v46, %v1592_v1  ;;  %v1210_v10 = vsel %vm365_vm1, %v1209_v59, %v1208_v2  ;;  %v1454_v11 = vld [vmem:[%s2458_s26 + $0x6f] sm:$0x1]  ;;  %v1455_v12 = vld [vmem:[%s2458_s26 + $0x73] sm:$0x1]  ;;  %v1456_v13 = vld [vmem:[%s2458_s26 + $0x77] sm:$0x1] }
  0x77   : > { %v1596_v14 = vsel %vm380_vm6, %v1595_v5, %v1594_v9  ;;  %v1212_v15 = vsel %vm368_vm2, %v1211_v61, %v1210_v10  ;;  %v1457_v16 = vld [vmem:[%s2458_s26 + $0x7b] sm:$0x1]  ;;  %v1458_v18 = vld [vmem:[%s2458_s26 + $0x7f] sm:$0x1]  ;;  %v1597_v19 = vrot.slane %v1452_v8, 7  ;;  %v1599_v20 = vrot.slane %v1453_v7, 6 }
  0x78   : > { %2109 = vmatprep.mubr.msk.f32.mxu1 %vm480_vm7, %v1596_v14  ;;  %v1214_v21 = vsel %vm371_vm3, %v1213_v62, %v1212_v15  ;;  %v1601_v22 = vrot.slane %v1454_v11, 5  ;;  %v1603_v3 = vrot.slane %v1455_v12, 4  ;;  %v1605_v23 = vrot.slane %v1456_v13, 3  ;;  %v1069_v24 = vld [vmem:[%s2458_s26 + $0x82] sm:$0x1] }
  0x79   : > { %v1216_v25 = vsel %vm374_vm4, %v1215_v63, %v1214_v21  ;;  %v1598_v26 = vsel %vm362_vm0, %v1597_v19, %v1451_v0  ;;  %v1607_v27 = vrot.slane %v1457_v16, 2  ;;  %v1609_v28 = vrot.slane %v1458_v18, 1  ;;  %v1070_v29 = vld [vmem:[%s2458_s26 + $0x86] sm:$0x1]  ;;  %v1071_v30 = vld [vmem:[%s2458_s26 + $0x8a] sm:$0x1] }
  0x7a   : > { %v1218_v31 = vsel %vm377_vm5, %v1217_v4, %v1216_v25  ;;  %v1600_v17 = vsel %vm365_vm1, %v1599_v20, %v1598_v26  ;;  %v1072_v32 = vld [vmem:[%s2458_s26 + $0x8e] sm:$0x1]  ;;  %v1073_v33 = vld [vmem:[%s2458_s26 + $0x92] sm:$0x1]  ;;  %v1074_v34 = vld [vmem:[%s2458_s26 + $0x96] sm:$0x1] }
  0x7b   : > { %v1220_v35 = vsel %vm380_vm6, %v1219_v6, %v1218_v31  ;;  %v1602_v36 = vsel %vm368_vm2, %v1601_v22, %v1600_v17  ;;  %v1075_v37 = vld [vmem:[%s2458_s26 + $0x9a] sm:$0x1]  ;;  %v1076_v38 = vld [vmem:[%s2458_s26 + $0x9e] sm:$0x1]  ;;  %v1221_v39 = vrot.slane %v1070_v29, 7  ;;  %v1223_v40 = vrot.slane %v1071_v30, 6 }
  0x7c   : > { %2082 = vmatmul.mubr.msk.f32.gmra.mrb[10].mxu0 %vm480_vm7, %v1220_v35  ;;  %v1604_v41 = vsel %vm371_vm3, %v1603_v3, %v1602_v36  ;;  %v1225_v42 = vrot.slane %v1072_v32, 5  ;;  %v1227_v43 = vrot.slane %v1073_v33, 4  ;;  %v1229_v44 = vrot.slane %v1074_v34, 3  ;;  %v1459_v45 = vld [vmem:[%s2458_s26 + $0x83] sm:$0x1] }
  0x7d   : > { %v1606_v46 = vsel %vm374_vm4, %v1605_v23, %v1604_v41  ;;  %v1222_v5 = vsel %vm362_vm0, %v1221_v39, %v1069_v24  ;;  %v1231_v47 = vrot.slane %v1075_v37, 2  ;;  %v1233_v48 = vrot.slane %v1076_v38, 1  ;;  %v1460_v49 = vld [vmem:[%s2458_s26 + $0x87] sm:$0x1]  ;;  %v1461_v50 = vld [vmem:[%s2458_s26 + $0x8b] sm:$0x1] }
  0x7e   : > { %v1608_v51 = vsel %vm377_vm5, %v1607_v27, %v1606_v46  ;;  %v1224_v52 = vsel %vm365_vm1, %v1223_v40, %v1222_v5  ;;  %v1462_v53 = vld [vmem:[%s2458_s26 + $0x8f] sm:$0x1]  ;;  %v1463_v54 = vld [vmem:[%s2458_s26 + $0x93] sm:$0x1]  ;;  %v1464_v55 = vld [vmem:[%s2458_s26 + $0x97] sm:$0x1] }
  0x7f   : > { %v1610_v56 = vsel %vm380_vm6, %v1609_v28, %v1608_v51  ;;  %v1226_v57 = vsel %vm368_vm2, %v1225_v42, %v1224_v52  ;;  %v1465_v58 = vld [vmem:[%s2458_s26 + $0x9b] sm:$0x1]  ;;  %v1466_v59 = vld [vmem:[%s2458_s26 + $0x9f] sm:$0x1]  ;;  %v1611_v60 = vrot.slane %v1460_v49, 7  ;;  %v1613_v61 = vrot.slane %v1461_v50, 6 }
  0x80   : > { %2110 = vmatmul.mubr.msk.f32.gmra.mrb[10].mxu1 %vm480_vm7, %v1610_v56  ;;  %v1228_v62 = vsel %vm371_vm3, %v1227_v43, %v1226_v57  ;;  %v1615_v63 = vrot.slane %v1462_v53, 5  ;;  %v1617_v0 = vrot.slane %v1463_v54, 4  ;;  %v1619_v1 = vrot.slane %v1464_v55, 3  ;;  %v1077_v2 = vld [vmem:[%s2458_s26 + $0xa2] sm:$0x1] }
  0x81   : > { %v1230_v4 = vsel %vm374_vm4, %v1229_v44, %v1228_v62  ;;  %v1612_v6 = vsel %vm362_vm0, %v1611_v60, %v1459_v45  ;;  %v1621_v8 = vrot.slane %v1465_v58, 2  ;;  %v1623_v7 = vrot.slane %v1466_v59, 1  ;;  %v1078_v9 = vld [vmem:[%s2458_s26 + $0xa6] sm:$0x1]  ;;  %v1079_v10 = vld [vmem:[%s2458_s26 + $0xaa] sm:$0x1] }
  0x82   : > { %v1232_v11 = vsel %vm377_vm5, %v1231_v47, %v1230_v4  ;;  %v1614_v12 = vsel %vm365_vm1, %v1613_v61, %v1612_v6  ;;  %v1080_v13 = vld [vmem:[%s2458_s26 + $0xae] sm:$0x1]  ;;  %v1081_v14 = vld [vmem:[%s2458_s26 + $0xb2] sm:$0x1]  ;;  %v1082_v15 = vld [vmem:[%s2458_s26 + $0xb6] sm:$0x1] }
  0x83   : > { %v1234_v16 = vsel %vm380_vm6, %v1233_v48, %v1232_v11  ;;  %v1616_v18 = vsel %vm368_vm2, %v1615_v63, %v1614_v12  ;;  %v1083_v19 = vld [vmem:[%s2458_s26 + $0xba] sm:$0x1]  ;;  %v1084_v20 = vld [vmem:[%s2458_s26 + $0xbe] sm:$0x1]  ;;  %v1235_v21 = vrot.slane %v1078_v9, 7  ;;  %v1237_v22 = vrot.slane %v1079_v10, 6 }
  0x84   : > { %2084 = vmatprep.mubr.msk.f32.mxu0 %vm480_vm7, %v1234_v16  ;;  %v1618_v3 = vsel %vm371_vm3, %v1617_v0, %v1616_v18  ;;  %v1239_v23 = vrot.slane %v1080_v13, 5  ;;  %v1241_v24 = vrot.slane %v1081_v14, 4  ;;  %v1243_v25 = vrot.slane %v1082_v15, 3  ;;  %v1467_v26 = vld [vmem:[%s2458_s26 + $0xa3] sm:$0x1] }
  0x85   : > { %v1620_v27 = vsel %vm374_vm4, %v1619_v1, %v1618_v3  ;;  %v1236_v28 = vsel %vm362_vm0, %v1235_v21, %v1077_v2  ;;  %v1245_v29 = vrot.slane %v1083_v19, 2  ;;  %v1247_v30 = vrot.slane %v1084_v20, 1  ;;  %v1468_v31 = vld [vmem:[%s2458_s26 + $0xa7] sm:$0x1]  ;;  %v1469_v17 = vld [vmem:[%s2458_s26 + $0xab] sm:$0x1] }
  0x86   : > { %v1622_v32 = vsel %vm377_vm5, %v1621_v8, %v1620_v27  ;;  %v1238_v33 = vsel %vm365_vm1, %v1237_v22, %v1236_v28  ;;  %v1470_v34 = vld [vmem:[%s2458_s26 + $0xaf] sm:$0x1]  ;;  %v1471_v35 = vld [vmem:[%s2458_s26 + $0xb3] sm:$0x1]  ;;  %v1472_v36 = vld [vmem:[%s2458_s26 + $0xb7] sm:$0x1] }
  0x87   : > { %v1624_v37 = vsel %vm380_vm6, %v1623_v7, %v1622_v32  ;;  %v1240_v38 = vsel %vm368_vm2, %v1239_v23, %v1238_v33  ;;  %v1473_v39 = vld [vmem:[%s2458_s26 + $0xbb] sm:$0x1]  ;;  %v1474_v40 = vld [vmem:[%s2458_s26 + $0xbf] sm:$0x1]  ;;  %v1625_v41 = vrot.slane %v1468_v31, 7  ;;  %v1627_v42 = vrot.slane %v1469_v17, 6 }
  0x88   : > { %2112 = vmatprep.mubr.msk.f32.mxu1 %vm480_vm7, %v1624_v37  ;;  %v1242_v43 = vsel %vm371_vm3, %v1241_v24, %v1240_v38  ;;  %v1629_v44 = vrot.slane %v1470_v34, 5  ;;  %v1631_v45 = vrot.slane %v1471_v35, 4  ;;  %v1633_v46 = vrot.slane %v1472_v36, 3  ;;  %v1085_v5 = vld [vmem:[%s2458_s26 + $0xc2] sm:$0x1] }
  0x89   : > { %v1244_v47 = vsel %vm374_vm4, %v1243_v25, %v1242_v43  ;;  %v1626_v48 = vsel %vm362_vm0, %v1625_v41, %v1467_v26  ;;  %v1635_v49 = vrot.slane %v1473_v39, 2  ;;  %v1637_v50 = vrot.slane %v1474_v40, 1  ;;  %v1086_v51 = vld [vmem:[%s2458_s26 + $0xc6] sm:$0x1]  ;;  %v1087_v52 = vld [vmem:[%s2458_s26 + $0xca] sm:$0x1] }
  0x8a   : > { %v1246_v53 = vsel %vm377_vm5, %v1245_v29, %v1244_v47  ;;  %v1628_v54 = vsel %vm365_vm1, %v1627_v42, %v1626_v48  ;;  %v1088_v55 = vld [vmem:[%s2458_s26 + $0xce] sm:$0x1]  ;;  %v1089_v56 = vld [vmem:[%s2458_s26 + $0xd2] sm:$0x1]  ;;  %v1090_v57 = vld [vmem:[%s2458_s26 + $0xd6] sm:$0x1] }
  0x8b   : > { %v1248_v58 = vsel %vm380_vm6, %v1247_v30, %v1246_v53  ;;  %v1630_v59 = vsel %vm368_vm2, %v1629_v44, %v1628_v54  ;;  %v1091_v60 = vld [vmem:[%s2458_s26 + $0xda] sm:$0x1]  ;;  %v1092_v61 = vld [vmem:[%s2458_s26 + $0xde] sm:$0x1]  ;;  %v1249_v62 = vrot.slane %v1086_v51, 7  ;;  %v1251_v63 = vrot.slane %v1087_v52, 6 }
  0x8c   : > { %2085 = vmatmul.mubr.msk.f32.gmra.mrb[12].mxu0 %vm480_vm7, %v1248_v58  ;;  %v1632_v0 = vsel %vm371_vm3, %v1631_v45, %v1630_v59  ;;  %v1253_v1 = vrot.slane %v1088_v55, 5  ;;  %v1255_v2 = vrot.slane %v1089_v56, 4  ;;  %v1257_v4 = vrot.slane %v1090_v57, 3  ;;  %v1475_v6 = vld [vmem:[%s2458_s26 + $0xc3] sm:$0x1] }
  0x8d   : > { %v1634_v8 = vsel %vm374_vm4, %v1633_v46, %v1632_v0  ;;  %v1250_v7 = vsel %vm362_vm0, %v1249_v62, %v1085_v5  ;;  %v1259_v9 = vrot.slane %v1091_v60, 2  ;;  %v1261_v10 = vrot.slane %v1092_v61, 1  ;;  %v1476_v11 = vld [vmem:[%s2458_s26 + $0xc7] sm:$0x1]  ;;  %v1477_v12 = vld [vmem:[%s2458_s26 + $0xcb] sm:$0x1] }
  0x8e   : > { %v1636_v13 = vsel %vm377_vm5, %v1635_v49, %v1634_v8  ;;  %v1252_v14 = vsel %vm365_vm1, %v1251_v63, %v1250_v7  ;;  %v1478_v15 = vld [vmem:[%s2458_s26 + $0xcf] sm:$0x1]  ;;  %v1479_v16 = vld [vmem:[%s2458_s26 + $0xd3] sm:$0x1]  ;;  %v1480_v18 = vld [vmem:[%s2458_s26 + $0xd7] sm:$0x1] }
  0x8f   : > { %v1638_v19 = vsel %vm380_vm6, %v1637_v50, %v1636_v13  ;;  %v1254_v20 = vsel %vm368_vm2, %v1253_v1, %v1252_v14  ;;  %v1481_v21 = vld [vmem:[%s2458_s26 + $0xdb] sm:$0x1]  ;;  %v1482_v22 = vld [vmem:[%s2458_s26 + $0xdf] sm:$0x1]  ;;  %v1639_v3 = vrot.slane %v1476_v11, 7  ;;  %v1641_v23 = vrot.slane %v1477_v12, 6 }
  0x90   : > { %2113 = vmatmul.mubr.msk.f32.gmra.mrb[12].mxu1 %vm480_vm7, %v1638_v19  ;;  %v1256_v24 = vsel %vm371_vm3, %v1255_v2, %v1254_v20  ;;  %v1643_v25 = vrot.slane %v1478_v15, 5  ;;  %v1645_v26 = vrot.slane %v1479_v16, 4  ;;  %v1647_v27 = vrot.slane %v1480_v18, 3  ;;  %v1093_v28 = vld [vmem:[%s2458_s26 + $0xe2] sm:$0x1] }
  0x91   : > { %v1258_v29 = vsel %vm374_vm4, %v1257_v4, %v1256_v24  ;;  %v1640_v30 = vsel %vm362_vm0, %v1639_v3, %v1475_v6  ;;  %v1649_v31 = vrot.slane %v1481_v21, 2  ;;  %v1651_v17 = vrot.slane %v1482_v22, 1  ;;  %v1094_v32 = vld [vmem:[%s2458_s26 + $0xe6] sm:$0x1]  ;;  %v1095_v33 = vld [vmem:[%s2458_s26 + $0xea] sm:$0x1] }
  0x92   : > { %v1260_v34 = vsel %vm377_vm5, %v1259_v9, %v1258_v29  ;;  %v1642_v35 = vsel %vm365_vm1, %v1641_v23, %v1640_v30  ;;  %v1096_v36 = vld [vmem:[%s2458_s26 + $0xee] sm:$0x1]  ;;  %v1097_v37 = vld [vmem:[%s2458_s26 + $0xf2] sm:$0x1]  ;;  %v1098_v38 = vld [vmem:[%s2458_s26 + $0xf6] sm:$0x1]  ;;  %v192_v21 = vlaneseq }
  0x93   : > { %v1262_v39 = vsel %vm380_vm6, %v1261_v10, %v1260_v34  ;;  %v1644_v40 = vsel %vm368_vm2, %v1643_v25, %v1642_v35  ;;  %v1099_v41 = vld [vmem:[%s2458_s26 + $0xfa] sm:$0x1]  ;;  %v1100_v42 = vld [vmem:[%s2458_s26 + $0xfe] sm:$0x1]  ;;  %v1263_v43 = vrot.slane %v1094_v32, 7  ;;  %v1265_v44 = vrot.slane %v1095_v33, 6 }
  0x94   : > { %2087 = vmatprep.mubr.msk.f32.mxu0 %vm480_vm7, %v1262_v39  ;;  %v1646_v45 = vsel %vm371_vm3, %v1645_v26, %v1644_v40  ;;  %v1267_v46 = vrot.slane %v1096_v36, 5  ;;  %v1269_v5 = vrot.slane %v1097_v37, 4  ;;  %v1271_v47 = vrot.slane %v1098_v38, 3  ;;  %v1483_v48 = vld [vmem:[%s2458_s26 + $0xe3] sm:$0x1] }
  0x95   : > { %v1648_v49 = vsel %vm374_vm4, %v1647_v27, %v1646_v45  ;;  %v1264_v50 = vsel %vm362_vm0, %v1263_v43, %v1093_v28  ;;  %v1273_v51 = vrot.slane %v1099_v41, 2  ;;  %v1275_v52 = vrot.slane %v1100_v42, 1  ;;  %v1484_v53 = vld [vmem:[%s2458_s26 + $0xe7] sm:$0x1]  ;;  %v1485_v54 = vld [vmem:[%s2458_s26 + $0xeb] sm:$0x1] }
  0x96   : > { %v1650_v55 = vsel %vm377_vm5, %v1649_v31, %v1648_v49  ;;  %v1266_v56 = vsel %vm365_vm1, %v1265_v44, %v1264_v50  ;;  %v1486_v57 = vld [vmem:[%s2458_s26 + $0xef] sm:$0x1]  ;;  %v1487_v58 = vld [vmem:[%s2458_s26 + $0xf3] sm:$0x1]  ;;  %v1488_v59 = vld [vmem:[%s2458_s26 + $0xf7] sm:$0x1]  ;;  %v3011_v28 = vstv %s2424_s30 }
  0x97   : > { %v1652_v60 = vsel %vm380_vm6, %v1651_v17, %v1650_v55  ;;  %v1268_v61 = vsel %vm368_vm2, %v1267_v46, %v1266_v56  ;;  %v1489_v62 = vld [vmem:[%s2458_s26 + $0xfb] sm:$0x1]  ;;  %v1653_v63 = vrot.slane %v1484_v53, 7  ;;  %v1655_v0 = vrot.slane %v1485_v54, 6  ;;  %v1490_v2 = vld [vmem:[%s2458_s26 + $0xff] sm:$0x1] }
  0x98   : > { %2115 = vmatprep.mubr.msk.f32.mxu1 %vm480_vm7, %v1652_v60  ;;  %v1270_v1 = vsel %vm371_vm3, %v1269_v5, %v1268_v61  ;;  %v1657_v4 = vrot.slane %v1486_v57, 5  ;;  %v1659_v6 = vrot.slane %v1487_v58, 4  ;;  %v1661_v9 = vrot.slane %v1488_v59, 3  ;;  %v3003_v22 = vld [vmem:[%s3198_s2] ss:$0 sm:$0xff] }
  0x99   : > { %v1272_v8 = vsel %vm374_vm4, %v1271_v47, %v1270_v1  ;;  %v1654_v7 = vsel %vm362_vm0, %v1653_v63, %v1483_v48  ;;  %v1663_v12 = vrot.slane %v1489_v62, 2  ;;  %v1665_v15 = vrot.slane %v1490_v2, 1 }
  0x9a   : > { %v1274_v10 = vsel %vm377_vm5, %v1273_v51, %v1272_v8  ;;  %v1656_v11 = vsel %vm365_vm1, %v1655_v0, %v1654_v7  ;;  %v3005_v3 = vshrl.u32 %v192_v21, 7  ;;  %vm1817_vm0 = vcmask 1040384  }
  0x9b   : > { %v1276_v13 = vsel %vm380_vm6, %v1275_v52, %v1274_v10  ;;  %v1658_v14 = vsel %vm368_vm2, %v1657_v4, %v1656_v11  ;;  %vm1819_vm1 = vcmask 1041408   ;;  %vm1821_vm2 = vcmask 1042432  }
  0x9c   : > { %2088 = vmatmul.mubr.msk.f32.gmra.mrb[14].mxu0 %vm480_vm7, %v1276_v13  ;;  %v1660_v16 = vsel %vm371_vm3, %v1659_v6, %v1658_v14  ;;  %v194_v27 = vadd.s32 8, %v3005_v3  ;;  %v3020_v33 = vadd.s32 %v3011_v28, %v3005_v3  ;;  %v195_v48 = vadd.s32 16, %v3005_v3 }
  0x9d   : > { %v1662_v18 = vsel %vm374_vm4, %v1661_v9, %v1660_v16  ;;  %v196_v51 = vadd.s32 24, %v3005_v3  ;;  %v197_v7 = vadd.s32 32, %v3005_v3 }
  0x9e   : > { %v1664_v19 = vsel %vm377_vm5, %v1663_v12, %v1662_v18  ;;  %v3016_v32 = vadd.s32 %v3011_v28, %v194_v27  ;;  %vm210_vm9 = vcmp.lt.s32.totalorder %v3020_v33, 200  ;;  %v3039_v53 = vadd.s32 %v3011_v28, %v195_v48 }
  0x9f   : > { %v1666_v20 = vsel %vm380_vm6, %v1665_v15, %v1664_v19  ;;  %v3042_v54 = vadd.s32 %v3011_v28, %v196_v51  ;;  %v198_v12 = vadd.s32 40, %v3005_v3  ;;  %v3061_v15 = vadd.s32 %v3011_v28, %v197_v7 }
  0xa0   : > { %2116 = vmatmul.mubr.msk.f32.gmra.mrb[14].mxu1 %vm480_vm7, %v1666_v20  ;;  %vm211_vm8 = vcmp.lt.s32.totalorder %v3016_v32, 200  ;;  %vm212_vm10 = vcmp.lt.s32.totalorder %v3039_v53, 200 }
  0xa1   : > { %vm213_vm11 = vcmp.lt.s32.totalorder %v3042_v54, 200  ;;  %v3064_v16 = vadd.s32 %v3011_v28, %v198_v12  ;;  %vm214_vm12 = vcmp.lt.s32.totalorder %v3061_v15, 200 }
  0xa3   : > { %vm215_vm13 = vcmp.lt.s32.totalorder %v3064_v16, 200 }
  0xff   : > { %v2024_v23 = vpop.f32.mrb[0].mxu0 }
 0x100   : > { %v569_v24 = vadd.f32 %v2024_v23, %v3003_v22  ;;  %v563_v25 = vpop.f32.mrb[1].mxu0 }
 0x101   : > { %v564_v26 = vadd.f32 %v3003_v22, %v563_v25 }
 0x102   : > { %2221 = vtanh.f32 %v569_v24 }
 0x103   : > { %2223 = vtanh.f32 %v564_v26  ;;  %v2052_v29 = vpop.f32.mrb[0].mxu1 }
 0x104   : > { %v975_v30 = vadd.f32 %v2052_v29, %v3003_v22  ;;  %v969_v31 = vpop.f32.mrb[1].mxu1 }
 0x105   : > { %v970_v17 = vadd.f32 %v3003_v22, %v969_v31 }
 0x106   : > { %2225 = vtanh.f32 %v975_v30 }
 0x107   : > { %2227 = vtanh.f32 %v970_v17 }
 0x10c   : > { %v2222_v34 = vpop.eup %2221 }
 0x10d   : > { %v2224_v35 = vpop.eup %2223  ;;  %v627_v36 = vsel %vm211_vm8, %v2222_v34, 0.0 }
 0x10e   : > { %v626_v37 = vsel %vm210_vm9, %v2224_v35, 0.0 }
 0x10f   : > { %v634_v38 = vadd.f32 %v627_v36, %v626_v37  ;;  %v2027_v39 = vpop.f32.mrb[2].mxu0  ;;  %v199_v36 = vadd.s32 48, %v3005_v3 }
 0x110   : > { %v2226_v40 = vpop.eup %2225  ;;  %v579_v41 = vadd.f32 %v2027_v39, %v3003_v22  ;;  %v573_v42 = vpop.f32.mrb[3].mxu0 }
 0x111   : > { %v2228_v43 = vpop.eup %2227  ;;  %v1017_v44 = vsel %vm211_vm8, %v2226_v40, 0.0  ;;  %v574_v45 = vadd.f32 %v3003_v22, %v573_v42  ;;  %v200_v40 = vadd.s32 56, %v3005_v3 }
 0x112   : > { %v1016_v46 = vsel %vm210_vm9, %v2228_v43, 0.0  ;;  %2229 = vtanh.f32 %v579_v41  ;;  %v3083_v43 = vadd.s32 %v3011_v28, %v199_v36 }
 0x113   : > { %v1024_v5 = vadd.f32 %v1017_v44, %v1016_v46  ;;  %v2055_v47 = vpop.f32.mrb[2].mxu1  ;;  %2231 = vtanh.f32 %v574_v45  ;;  %v3086_v44 = vadd.s32 %v3011_v28, %v200_v40 }
 0x114   : > { %v985_v49 = vadd.f32 %v2055_v47, %v3003_v22  ;;  %v979_v50 = vpop.f32.mrb[3].mxu1  ;;  %vm216_vm14 = vcmp.lt.s32.totalorder %v3083_v43, 200 }
 0x115   : > { %v980_v52 = vadd.f32 %v3003_v22, %v979_v50  ;;  %vm217_vm15 = vcmp.lt.s32.totalorder %v3086_v44, 200 }
 0x116   : > { %2233 = vtanh.f32 %v985_v49 }
 0x117   : > { %2235 = vtanh.f32 %v980_v52 }
 0x11c   : > { %v2230_v55 = vpop.eup %2229 }
 0x11d   : > { %v2232_v56 = vpop.eup %2231  ;;  %v629_v61 = vsel %vm213_vm11, %v2230_v55, 0.0 }
 0x11e   : > { %v628_v57 = vsel %vm212_vm10, %v2232_v56, 0.0 }
 0x11f   : > { %v635_v58 = vadd.f32 %v634_v38, %v628_v57  ;;  %v2030_v59 = vpop.f32.mrb[4].mxu0 }
 0x120   : > { %v2234_v60 = vpop.eup %2233  ;;  %v589_v62 = vadd.f32 %v2030_v59, %v3003_v22  ;;  %v583_v63 = vpop.f32.mrb[5].mxu0 }
 0x121   : > { %v2236_v0 = vpop.eup %2235  ;;  %v584_v1 = vadd.f32 %v3003_v22, %v583_v63  ;;  %v636_v2 = vadd.f32 %v635_v58, %v629_v61  ;;  %v1019_v9 = vsel %vm213_vm11, %v2234_v60, 0.0 }
 0x122   : > { %v1018_v4 = vsel %vm212_vm10, %v2236_v0, 0.0  ;;  %2237 = vtanh.f32 %v589_v62 }
 0x123   : > { %v1025_v6 = vadd.f32 %v1024_v5, %v1018_v4  ;;  %v2058_v8 = vpop.f32.mrb[4].mxu1  ;;  %2239 = vtanh.f32 %v584_v1 }
 0x124   : > { %v995_v10 = vadd.f32 %v2058_v8, %v3003_v22  ;;  %v989_v11 = vpop.f32.mrb[5].mxu1 }
 0x125   : > { %v990_v13 = vadd.f32 %v3003_v22, %v989_v11  ;;  %v1026_v14 = vadd.f32 %v1025_v6, %v1019_v9 }
 0x126   : > { %2241 = vtanh.f32 %v995_v10 }
 0x127   : > { %2243 = vtanh.f32 %v990_v13 }
 0x12c   : > { %v2238_v18 = vpop.eup %2237 }
 0x12d   : > { %v2240_v19 = vpop.eup %2239  ;;  %v631_v25 = vsel %vm215_vm13, %v2238_v18, 0.0 }
 0x12e   : > { %v630_v20 = vsel %vm214_vm12, %v2240_v19, 0.0 }
 0x12f   : > { %v637_v21 = vadd.f32 %v636_v2, %v630_v20  ;;  %v2033_v23 = vpop.f32.mrb[6].mxu0 }
 0x130   : > { %v2242_v24 = vpop.eup %2241  ;;  %v599_v26 = vadd.f32 %v2033_v23, %v3003_v22  ;;  %v593_v27 = vpop.f32.mrb[7].mxu0 }
 0x131   : > { %v2244_v29 = vpop.eup %2243  ;;  %v594_v30 = vadd.f32 %v3003_v22, %v593_v27  ;;  %v638_v31 = vadd.f32 %v637_v21, %v631_v25  ;;  %v1021_v37 = vsel %vm215_vm13, %v2242_v24, 0.0 }
 0x132   : > { %v1020_v17 = vsel %vm214_vm12, %v2244_v29, 0.0  ;;  %2245 = vtanh.f32 %v599_v26 }
 0x133   : > { %v1027_v34 = vadd.f32 %v1026_v14, %v1020_v17  ;;  %v2061_v35 = vpop.f32.mrb[6].mxu1  ;;  %2247 = vtanh.f32 %v594_v30 }
 0x134   : > { %v1005_v38 = vadd.f32 %v2061_v35, %v3003_v22  ;;  %v999_v39 = vpop.f32.mrb[7].mxu1 }
 0x135   : > { %v1000_v41 = vadd.f32 %v3003_v22, %v999_v39  ;;  %v1028_v42 = vadd.f32 %v1027_v34, %v1021_v37 }
 0x136   : > { %2249 = vtanh.f32 %v1005_v38 }
 0x137   : > { %2251 = vtanh.f32 %v1000_v41 }
 0x13c   : > { %v2246_v45 = vpop.eup %2245 }
 0x13d   : > { %v2248_v46 = vpop.eup %2247  ;;  %v633_v49 = vsel %vm217_vm15, %v2246_v45, 0.0 }
 0x13e   : > { %v632_v3 = vsel %vm216_vm14, %v2248_v46, 0.0 }
 0x13f   : > { %v639_v5 = vadd.f32 %v638_v31, %v632_v3  ;;  %v2080_v47 = vpop.f32.mrb[8].mxu0 }
 0x140   : > { %v2250_v48 = vpop.eup %2249  ;;  %v1365_v50 = vadd.f32 %v2080_v47, %v3003_v22  ;;  %v1359_v51 = vpop.f32.mrb[9].mxu0 }
 0x141   : > { %v2252_v28 = vpop.eup %2251  ;;  %v640_v52 = vadd.f32 %v639_v5, %v633_v49  ;;  %v1360_v55 = vadd.f32 %v3003_v22, %v1359_v51  ;;  %v1023_v60 = vsel %vm217_vm15, %v2250_v48, 0.0 }
 0x142   : > { %v1022_v56 = vsel %vm216_vm14, %v2252_v28, 0.0  ;;  %2253 = vtanh.f32 %v1365_v50 }
 0x143   : > { %v641_v57 = vrot.slane %v640_v52, 4  ;;  %v1029_v58 = vadd.f32 %v1028_v42, %v1022_v56  ;;  %2255 = vtanh.f32 %v1360_v55  ;;  %v2108_v59 = vpop.f32.mrb[8].mxu1 }
 0x144   : > { %v1755_v61 = vadd.f32 %v2108_v59, %v3003_v22  ;;  %v1749_v62 = vpop.f32.mrb[9].mxu1 }
 0x145   : > { %v642_v63 = vadd.f32 %v641_v57, %v640_v52  ;;  %v1030_v0 = vadd.f32 %v1029_v58, %v1023_v60  ;;  %v1750_v1 = vadd.f32 %v3003_v22, %v1749_v62 }
 0x146   : > { %2257 = vtanh.f32 %v1755_v61 }
 0x147   : > { %v1031_v2 = vrot.slane %v1030_v0, 4  ;;  %2259 = vtanh.f32 %v1750_v1  ;;  %v643_v4 = vrot.slane %v642_v63, 2 }
 0x149   : > { %v1032_v6 = vadd.f32 %v1031_v2, %v1030_v0  ;;  %v644_v8 = vadd.f32 %v643_v4, %v642_v63 }
 0x14b   : > { %v645_v7 = vrot.slane %v644_v8, 1  ;;  %v1033_v9 = vrot.slane %v1032_v6, 2 }
 0x14c   : > { %v2254_v10 = vpop.eup %2253 }
 0x14d   : > { %v2256_v11 = vpop.eup %2255  ;;  %v1407_v12 = vsel %vm211_vm8, %v2254_v10, 0.0  ;;  %v1034_v13 = vadd.f32 %v1033_v9, %v1032_v6  ;;  %v646_v20 = vadd.f32 %v645_v7, %v644_v8 }
 0x14e   : > { %v1406_v14 = vsel %vm210_vm9, %v2256_v11, 0.0 }
 0x14f   : > { %v1414_v18 = vadd.f32 %v1407_v12, %v1406_v14  ;;  %v2083_v19 = vpop.f32.mrb[10].mxu0  ;;  %v1035_v21 = vrot.slane %v1034_v13, 1 }
 0x150   : > { %v2258_v23 = vpop.eup %2257  ;;  %v1375_v24 = vadd.f32 %v2083_v19, %v3003_v22  ;;  %v1369_v25 = vpop.f32.mrb[11].mxu0 }
 0x151   : > { %v2260_v26 = vpop.eup %2259  ;;  %v1797_v27 = vsel %vm211_vm8, %v2258_v23, 0.0  ;;  %v1370_v29 = vadd.f32 %v3003_v22, %v1369_v25  ;;  %v1036_v30 = vadd.f32 %v1035_v21, %v1034_v13 }
 0x152   : > { %v1796_v31 = vsel %vm210_vm9, %v2260_v26, 0.0  ;;  %2261 = vtanh.f32 %v1375_v24 }
 0x153   : > { %v1804_v17 = vadd.f32 %v1797_v27, %v1796_v31  ;;  %v2111_v34 = vpop.f32.mrb[10].mxu1  ;;  %2263 = vtanh.f32 %v1370_v29  ;;  %v3112_v35 = vsel %vm1817_vm0, %v646_v20, %v1036_v30 }
 0x154   : > { %v1765_v36 = vadd.f32 %v2111_v34, %v3003_v22  ;;  %v1759_v37 = vpop.f32.mrb[11].mxu1 }
 0x155   : > { %v1760_v38 = vadd.f32 %v3003_v22, %v1759_v37 }
 0x156   : > { %2265 = vtanh.f32 %v1765_v36 }
 0x157   : > { %2267 = vtanh.f32 %v1760_v38 }
 0x15c   : > { %v2262_v32 = vpop.eup %2261 }
 0x15d   : > { %v2264_v39 = vpop.eup %2263  ;;  %v1409_v45 = vsel %vm213_vm11, %v2262_v32, 0.0 }
 0x15e   : > { %v1408_v40 = vsel %vm212_vm10, %v2264_v39, 0.0 }
 0x15f   : > { %v1415_v33 = vadd.f32 %v1414_v18, %v1408_v40  ;;  %v2086_v41 = vpop.f32.mrb[12].mxu0 }
 0x160   : > { %v2266_v42 = vpop.eup %2265  ;;  %v1385_v46 = vadd.f32 %v2086_v41, %v3003_v22  ;;  %v1379_v3 = vpop.f32.mrb[13].mxu0 }
 0x161   : > { %v2268_v5 = vpop.eup %2267  ;;  %v1380_v47 = vadd.f32 %v3003_v22, %v1379_v3  ;;  %v1416_v48 = vadd.f32 %v1415_v33, %v1409_v45  ;;  %v1799_v28 = vsel %vm213_vm11, %v2266_v42, 0.0 }
 0x162   : > { %v1798_v49 = vsel %vm212_vm10, %v2268_v5, 0.0  ;;  %2269 = vtanh.f32 %v1385_v46 }
 0x163   : > { %v1805_v50 = vadd.f32 %v1804_v17, %v1798_v49  ;;  %v2114_v51 = vpop.f32.mrb[12].mxu1  ;;  %2271 = vtanh.f32 %v1380_v47 }
 0x164   : > { %v1775_v52 = vadd.f32 %v2114_v51, %v3003_v22  ;;  %v1769_v55 = vpop.f32.mrb[13].mxu1 }
 0x165   : > { %v1770_v56 = vadd.f32 %v3003_v22, %v1769_v55  ;;  %v1806_v57 = vadd.f32 %v1805_v50, %v1799_v28 }
 0x166   : > { %2273 = vtanh.f32 %v1775_v52 }
 0x167   : > { %2275 = vtanh.f32 %v1770_v56 }
 0x16c   : > { %v2270_v58 = vpop.eup %2269 }
 0x16d   : > { %v2272_v59 = vpop.eup %2271  ;;  %v1411_v54 = vsel %vm215_vm13, %v2270_v58, 0.0 }
 0x16e   : > { %v1410_v53 = vsel %vm214_vm12, %v2272_v59, 0.0 }
 0x16f   : > { %v1417_v60 = vadd.f32 %v1416_v48, %v1410_v53  ;;  %v2089_v61 = vpop.f32.mrb[14].mxu0 }
 0x170   : > { %v2274_v62 = vpop.eup %2273  ;;  %v1395_v63 = vadd.f32 %v2089_v61, %v3003_v22  ;;  %v1389_v0 = vpop.f32.mrb[15].mxu0 }
 0x171   : > { %v2276_v1 = vpop.eup %2275  ;;  %v1390_v2 = vadd.f32 %v3003_v22, %v1389_v0  ;;  %v1418_v4 = vadd.f32 %v1417_v60, %v1411_v54  ;;  %v1801_v9 = vsel %vm215_vm13, %v2274_v62, 0.0 }
 0x172   : > { %v1800_v6 = vsel %vm214_vm12, %v2276_v1, 0.0  ;;  %2277 = vtanh.f32 %v1395_v63 }
 0x173   : > { %v1807_v8 = vadd.f32 %v1806_v57, %v1800_v6  ;;  %v2117_v7 = vpop.f32.mrb[14].mxu1  ;;  %2279 = vtanh.f32 %v1390_v2 }
 0x174   : > { %v1785_v10 = vadd.f32 %v2117_v7, %v3003_v22  ;;  %v1779_v11 = vpop.f32.mrb[15].mxu1 }
 0x175   : > { %v1780_v12 = vadd.f32 %v3003_v22, %v1779_v11  ;;  %v1808_v13 = vadd.f32 %v1807_v8, %v1801_v9 }
 0x176   : > { %2281 = vtanh.f32 %v1785_v10 }
 0x177   : > { %2283 = vtanh.f32 %v1780_v12 }
 0x17c   : > { %v2278_v14 = vpop.eup %2277 }
 0x17d   : > { %v2280_v18 = vpop.eup %2279  ;;  %v1413_v16 = vsel %vm217_vm15, %v2278_v14, 0.0 }
 0x17e   : > { %v1412_v15 = vsel %vm216_vm14, %v2280_v18, 0.0 }
 0x17f   : > { %v1419_v19 = vadd.f32 %v1418_v4, %v1412_v15 }
 0x180   : > { %v2282_v20 = vpop.eup %2281 }
 0x181   : > { %v2284_v21 = vpop.eup %2283  ;;  %v1420_v23 = vadd.f32 %v1419_v19, %v1413_v16  ;;  %v1803_v26 = vsel %vm217_vm15, %v2282_v20, 0.0 }
 0x182   : > { %v1802_v24 = vsel %vm216_vm14, %v2284_v21, 0.0 }
 0x183   : > { %v1421_v22 = vrot.slane %v1420_v23, 4  ;;  %v1809_v25 = vadd.f32 %v1808_v13, %v1802_v24 }
 0x185   : > { %v1422_v27 = vadd.f32 %v1421_v22, %v1420_v23  ;;  %v1810_v29 = vadd.f32 %v1809_v25, %v1803_v26 }
 0x187   : > { %v1423_v30 = vrot.slane %v1422_v27, 2  ;;  %v1811_v31 = vrot.slane %v1810_v29, 4 }
 0x189   : > { %v1424_v17 = vadd.f32 %v1423_v30, %v1422_v27  ;;  %v1812_v34 = vadd.f32 %v1811_v31, %v1810_v29 }
 0x18b   : > { %v1425_v36 = vrot.slane %v1424_v17, 1  ;;  %v1813_v37 = vrot.slane %v1812_v34, 2 }
 0x18d   : > { %v1426_v43 = vadd.f32 %v1425_v36, %v1424_v17  ;;  %v1814_v38 = vadd.f32 %v1813_v37, %v1812_v34 }
 0x18f   : > { %v1815_v32 = vrot.slane %v1814_v38, 1  ;;  %v1820_v39 = vsel %vm1819_vm1, %v3112_v35, %v1426_v43 }
 0x191   : > { %v1816_v44 = vadd.f32 %v1815_v32, %v1814_v38 }
 0x193   : > { %v1822_v40 = vsel %vm1821_vm2, %v1820_v39, %v1816_v44 }
 0x194   : > { %1823 = vst [vmem:[%s176_s5] sm:$0xf] %v1822_v40 }
 0x195   : > { %2298 = shalt.err (!%p2295_p3)
}
 0x196   : > { %s2299_s30 = scalar_lea.hbm %s3154_s9, 64  ;;  %s2303_s25 = scalar_lea.hbm %s3199_s3, 256 }
 0x197   : > { %p2300_p4 = scmp.ne.s32.totalorder %s3154_s9, %s2299_s30  ;;  %p2304_p9 = scmp.lt.u32.totalorder %s3154_s9, %s3199_s3 }
 0x198   : > { %p2305_p10 = scmp.lt.u32.totalorder %s2303_s25, %s2299_s30  ;;  %p2307_p12 = scmp.lt.u32.totalorder %s2299_s30, %s3154_s9 }
 0x199   : > { %p2301_p7 = pnand %p2300_p4, %p2405_p5 }
 0x19a   : > { %p2306_p11 = por %p2305_p10, %p2304_p9 }
 0x19b   : > { %p2302_p8 = pneg %p2301_p7 }
 0x19c   : > { %p2308_p13 = por %p2307_p12, %p2306_p11 }
 0x19e   : > { %p2309_p0 = pnand %p2308_p13, %p2302_p8 }
 0x1a0   : > { %2312 = shalt.err (!%p2309_p0)
}
 0x1a1   : > { %2182 = dma.vmem_to_hbm [thread:$0]  (%p2405_p5), %s3156_s6, 64, %s3154_s9, %s1825_s10  }
 0x1a2 PF: > { %p2188_p1 = scmp.ge.s32.totalorder %s2347_s15, 2  ;;  %s1850_s28 = sand.u32 1, %s2335_s12  }
 0x1a3   : > { %s1851_s29 = scalar_lea.sflag [#allocation3], %s1850_s28 }
 0x1a4   : > { %p2185_p2 = pnand %p2188_p1, %p2409_p6 }
 0x1a6   : > { %2330 = dma.done.wait (!%p2185_p2), %s1851_s29, 64  }
 0x1a7   : > { %2332 = vsyncadd (!%p2185_p2), %s1851_s29, 4294967232  ;;  %p13_p3 = scmp.ge.s32.totalorder %s2393_s18, 6   ;;  %s3202_s12 = smov %s2339_s13 }
 0x1a8   : > { %s3203_s13 = smov %s2343_s14  ;;  %s3204_s14 = smov %s2403_s21 }
 0x1a9   : > { %s3205_s15 = smov %s2393_s18  ;;  %15 = sbr.rel (!%p13_p3) target bundleno = 3 (0x3), region = 67 }
 0x1b0   :  { %1856 = vsyncpa [#allocation3], 1 }
 0x1b1   :  { %1858 = vsyncpa [#allocation3 + $0x1], 1 }

</bundles_post_ra>
